<compile_context>
chip_gen: v5e
topology: v5e:2x2
jax: 0.10.0
libtpu: 0.0.40
codegen_flags: <defaults>
</compile_context>

<pallas_src>
import jax
import jax.numpy as jnp
from jax import lax
from jax.experimental import pallas as pl
from jax.experimental.pallas import tpu as pltpu

INPUT_DIM = 1
HIDDEN = 16          # hidden_layer_size
N_LAYERS = 2
HIDDEN_FC = 32       # hidden_fc_size
BN_EPS = 1e-5

_GATE_ROW = {"i": 0, "f": 1, "g": 2, "o": 3}                     # PyTorch row order
_GATE_PACK = (("i", 0.5), ("f", 0.5), ("o", 0.5), ("g", 1.0))    # packed order + pre-scale


def _rows(w, gate):
    j = _GATE_ROW[gate]
    return w[j * HIDDEN:(j + 1) * HIDDEN]


def _make_lstm_ts_kernel(B, S):
    """Build the fused LSTM_TS forward kernel for static (B, S)."""
    H = HIDDEN
    H2 = 2 * H                      # stacked hidden width [layer0 | layer1]
    GW = 8 * H                      # fused gate width: 2 layers x 4 gates x H

    def kernel(x_ref, wpk_ref, xproj_ref, brow_ref,
               fcw_ref, fcb_ref, gamma_ref, beta_ref, estw_ref, estb_ref,
               out_ref, hseq_ref):
        # x_ref:   (B, S)      inputs (INPUT_DIM == 1)
        # wpk:     (2H, 8H)    packed block recurrent weight [[Whh0|Wih1],[0|Whh1]],
        #                      columns grouped [I|F|O|G] x [layer0|layer1], i/f/o * 0.5
        # xproj:   (1, 8H)     Wih0 columns (scaled) at layer-0 lanes, zeros at layer-1
        # brow:    (1, 8H)     folded biases (b_ih+b_hh, both layers), pre-scaled
        # fcw:     (2H, F)     [0 ; fc_w.T]   (zero rows kill the layer-0 lanes)
        # fcb/gamma/beta/estw: (1, F)   estb: (1, 1)
        # out_ref: (B, S)      predictions; row-major flatten == PyTorch (b*S+s) order
        # hseq_ref:(S*B, 2H)   VMEM scratch; stacked hidden per fused step

        x_all = x_ref[...]                       # (B, S)
        wpk = wpk_ref[...]                       # (2H, 8H)
        xproj = xproj_ref[...]                   # (1, 8H)
        brow = brow_ref[...]                     # (1, 8H)

        # Per-lane sigmoid recovery: sigmoid(x) = 0.5*tanh(x/2) + 0.5
        # (i/f/o lanes pre-scaled by 0.5 host-side); g lanes stay pure tanh.
        lane = lax.broadcasted_iota(jnp.int32, (1, GW), 1)
        sig_mult = jnp.where(lane < 6 * H, 0.5, 1.0).astype(jnp.float32)
        sig_off = jnp.where(lane < 6 * H, 0.5, 0.0).astype(jnp.float32)
        # Lane mask keeping only the layer-0 half of the stacked state.
        lane2 = lax.broadcasted_iota(jnp.int32, (1, H2), 1)
        keep_l0 = jnp.where(lane2 < H, 1.0, 0.0).astype(jnp.float32)

        # Hoisted layer-0 input projections (+ folded biases): bulk pre-loop
        # work, completely off the serial recurrence chain.
        pre = [x_all[:, t:t + 1] * xproj + brow for t in range(S)]
        pre.append(brow)                         # t == S: layer-0 half unused

        h = jnp.zeros((B, H2), jnp.float32)      # [h0 | h1] lane-stacked
        c = jnp.zeros((B, H2), jnp.float32)      # [c0 | c1] lane-stacked

        # Software-pipelined recurrence: fused step t = layer-0 step t and
        # layer-1 step t-1.  ONE 128-lane MXU matmul + TWO tanh dispatches per
        # step; the add sits on the matmul result path (MRB accumulate on v7x).
        for t in range(S + 1):                   # fully unrolled (S static)
            gl = jnp.dot(h, wpk, preferred_element_type=jnp.float32) + pre[t]
            g = jnp.tanh(gl) * sig_mult + sig_off          # all 8 gates at once
            gi = g[:, 0 * H2:1 * H2]                       # [i0 | i1]
            gf = g[:, 1 * H2:2 * H2]                       # [f0 | f1]
            go = g[:, 2 * H2:3 * H2]                       # [o0 | o1]
            gg = g[:, 3 * H2:4 * H2]                       # [g0 | g1]
            c = gf * c + gi * gg
            h = go * jnp.tanh(c)                           # one tanh for c0 & c1
            if t == 0:
                # Layer-1 state must stay at its zero init until its first real
                # step (fused step 1).
                h = h * keep_l0
                c = c * keep_l0
            else:
                # Row block t-1 = layer-1 output at timestep t-1 (layer-0 lanes
                # are later zeroed by fcw's zero rows).  These stores are off
                # the critical chain: the recurrence never reads hseq_ref back.
                hseq_ref[(t - 1) * B:t * B, :] = h

        # ---- fused head: fc -> BatchNorm1d (batch stats) -> ReLU -> est -------
        y = hseq_ref[...]                                  # (S*B, 2H), read once
        z = (jnp.dot(y, fcw_ref[...], preferred_element_type=jnp.float32)
             + fcb_ref[...])                               # (S*B, F)
        mean = jnp.mean(z, axis=0, keepdims=True)
        var = jnp.maximum(jnp.mean(z * z, axis=0, keepdims=True) - mean * mean,
                          0.0)                             # biased var, one pass
        zn = (z - mean) * lax.rsqrt(var + BN_EPS)
        act = jnp.maximum(zn * gamma_ref[...] + beta_ref[...], 0.0)   # ReLU

        # est (F -> 1): ONE VPU multiply + ONE lane reduction over the slab.
        val = (jnp.sum(act * estw_ref[...], axis=-1, keepdims=True)
               + estb_ref[...])                            # (S*B, 1), row = s*B+b

        # Assemble the (B, S) output slab in-register (VPU selects), ONE store;
        # row-major flatten of out_ref matches PyTorch's (b*S + s) ordering.
        lane_s = lax.broadcasted_iota(jnp.int32, (B, S), 1)
        out_val = jnp.zeros((B, S), jnp.float32)
        for s in range(S):
            out_val = jnp.where(lane_s == s, val[s * B:(s + 1) * B, :], out_val)
        out_ref[...] = out_val

    return kernel


def init_params(key):
    """Raw parameters in PyTorch layout (nn.LSTM / nn.Linear / nn.BatchNorm1d)."""
    ks = jax.random.split(key, 12)
    s = 1.0 / jnp.sqrt(jnp.float32(HIDDEN))
    s_est = 1.0 / jnp.sqrt(jnp.float32(HIDDEN_FC))

    def u(k, shape, scale):
        return jax.random.uniform(k, shape, jnp.float32, -scale, scale)

    return {
        # LSTM layer 0 (input_dim -> H) and layer 1 (H -> H); gate rows i,f,g,o.
        "w_ih0": u(ks[0], (4 * HIDDEN, INPUT_DIM), s),
        "w_hh0": u(ks[1], (4 * HIDDEN, HIDDEN), s),
        "b0": u(ks[2], (4 * HIDDEN,), s) + u(ks[3], (4 * HIDDEN,), s),  # b_ih+b_hh
        "w_ih1": u(ks[4], (4 * HIDDEN, HIDDEN), s),
        "w_hh1": u(ks[5], (4 * HIDDEN, HIDDEN), s),
        "b1": u(ks[6], (4 * HIDDEN,), s) + u(ks[7], (4 * HIDDEN,), s),
        # Head.
        "fc_w": u(ks[8], (HIDDEN_FC, HIDDEN), s),
        "fc_b": u(ks[9], (HIDDEN_FC,), s),
        "bn_gamma": jnp.ones((HIDDEN_FC,), jnp.float32),
        "bn_beta": jnp.zeros((HIDDEN_FC,), jnp.float32),
        "est_w": u(ks[10], (1, HIDDEN_FC), s_est),
        "est_b": u(ks[11], (1,), s_est),
    }


def pack_params(p):
    """Host-side packing for the fused kernel (done once, outside the kernel)."""
    H = HIDDEN
    w_blocks, b_cols, x_cols = [], [], []
    for gate, sc in _GATE_PACK:
        top = jnp.concatenate([_rows(p["w_hh0"], gate).T,        # h0 -> layer-0 gate
                               _rows(p["w_ih1"], gate).T], 1)    # h0 -> layer-1 gate
        bot = jnp.concatenate([jnp.zeros((H, H), jnp.float32),   # h1 -> layer-0 gate
                               _rows(p["w_hh1"], gate).T], 1)    # h1 -> layer-1 gate
        w_blocks.append(jnp.concatenate([top, bot], 0) * sc)     # (2H, 2H)
        b_cols.append(jnp.concatenate([_rows(p["b0"], gate),
                                       _rows(p["b1"], gate)]) * sc)
        x_cols.append(jnp.concatenate([_rows(p["w_ih0"], gate)[:, 0] * sc,
                                       jnp.zeros((H,), jnp.float32)]))
    return {
        "w_packed": jnp.concatenate(w_blocks, axis=1),           # (2H, 8H)
        "xproj_row": jnp.concatenate(x_cols).reshape(1, 8 * H),  # (1, 8H)
        "bias_row": jnp.concatenate(b_cols).reshape(1, 8 * H),   # (1, 8H)
        "fcw_pad": jnp.concatenate([jnp.zeros((H, HIDDEN_FC), jnp.float32),
                                    p["fc_w"].T], axis=0),       # (2H, F)
        "fc_b": p["fc_b"].reshape(1, HIDDEN_FC),
        "bn_gamma": p["bn_gamma"].reshape(1, HIDDEN_FC),
        "bn_beta": p["bn_beta"].reshape(1, HIDDEN_FC),
        "est_w": p["est_w"].reshape(1, HIDDEN_FC),
        "est_b": p["est_b"].reshape(1, 1),
    }


@jax.jit
def lstm_ts_forward(x, packed):
    # x: (B, S, INPUT_DIM), batch-first (PyTorch convention), INPUT_DIM == 1
    B, S, _ = x.shape
    x_bs = x.reshape(B, S)                       # free reshape, no transpose/copy

    vmem = pl.BlockSpec(memory_space=pltpu.MemorySpace.VMEM)
    out_bs = pl.pallas_call(
        _make_lstm_ts_kernel(B, S),
        out_shape=jax.ShapeDtypeStruct((B, S), jnp.float32),
        in_specs=[vmem] * 10,
        out_specs=vmem,
        scratch_shapes=[pltpu.VMEM((S * B, 2 * HIDDEN), jnp.float32)],
    )(x_bs, packed["w_packed"], packed["xproj_row"], packed["bias_row"],
      packed["fcw_pad"], packed["fc_b"], packed["bn_gamma"], packed["bn_beta"],
      packed["est_w"], packed["est_b"])

    # (B, S) row-major flatten == PyTorch output.view(-1, H) -> est row order
    return out_bs.reshape(B * S, 1)


def reference_forward(x, p):
    """Pure-JAX reference mirroring the PyTorch module's forward (eval-mode LSTM)."""
    B, S, _ = x.shape
    H = HIDDEN

    def run_layer(inp_seq, w_ih, w_hh, b):
        h = jnp.zeros((B, H), jnp.float32)
        c = jnp.zeros((B, H), jnp.float32)
        outs = []
        for t in range(S):
            g = inp_seq[t] @ w_ih.T + h @ w_hh.T + b
            i = jax.nn.sigmoid(g[:, 0:H])
            f = jax.nn.sigmoid(g[:, H:2 * H])
            gg = jnp.tanh(g[:, 2 * H:3 * H])
            o = jax.nn.sigmoid(g[:, 3 * H:4 * H])
            c = f * c + i * gg
            h = o * jnp.tanh(c)
            outs.append(h)
        return outs

    l0 = run_layer([x[:, t, :] for t in range(S)], p["w_ih0"], p["w_hh0"], p["b0"])
    # TODO(synk): inter-layer dropout (p=0.1) skipped (inference semantics).
    l1 = run_layer(l0, p["w_ih1"], p["w_hh1"], p["b1"])
    y = jnp.stack(l1, axis=1).reshape(B * S, H)            # row = b*S + s
    z = y @ p["fc_w"].T + p["fc_b"]
    mean = jnp.mean(z, axis=0, keepdims=True)
    var = jnp.mean((z - mean) ** 2, axis=0, keepdims=True)
    zn = (z - mean) / jnp.sqrt(var + BN_EPS)
    a = jnp.maximum(zn * p["bn_gamma"] + p["bn_beta"], 0.0)
    return a @ p["est_w"].T + p["est_b"]


if __name__ == "__main__":
    key = jax.random.PRNGKey(0)
    k_x, k_p = jax.random.split(key)

    B, S = 4, 8
    x = jax.random.normal(k_x, (B, S, INPUT_DIM), dtype=jnp.float32)
    raw = init_params(k_p)
    packed = pack_params(raw)

    out = lstm_ts_forward(x, packed)
    jax.block_until_ready(out)
    assert out.shape == (B * S, 1), out.shape

    # Numerical parity check against a pure-JAX reference of the module.
    ref = reference_forward(x, raw)
    max_err = float(jnp.max(jnp.abs(out - ref)))
    assert jnp.allclose(out, ref, atol=1e-3, rtol=1e-3), max_err

    print("KERNEL_OK")
</pallas_src>

<mosaic_0001>
module attributes {stable_mosaic.version = 11 : i64} {
  func.func @kernel(%arg0: memref<4x8xf32, #tpu.memory_space<vmem>>, %arg1: memref<32x128xf32, #tpu.memory_space<vmem>>, %arg2: memref<1x128xf32, #tpu.memory_space<vmem>>, %arg3: memref<1x128xf32, #tpu.memory_space<vmem>>, %arg4: memref<32x32xf32, #tpu.memory_space<vmem>>, %arg5: memref<1x32xf32, #tpu.memory_space<vmem>>, %arg6: memref<1x32xf32, #tpu.memory_space<vmem>>, %arg7: memref<1x32xf32, #tpu.memory_space<vmem>>, %arg8: memref<1x32xf32, #tpu.memory_space<vmem>>, %arg9: memref<1x1xf32, #tpu.memory_space<vmem>>, %arg10: memref<4x8xf32, #tpu.memory_space<vmem>>, %arg11: memref<32x32xf32, #tpu.memory_space<vmem>>) attributes {dimension_semantics = [], scalar_prefetch = 0 : i64, scratch_operands = 1 : i64, tpu.core_type = #tpu.core_type<tc>} {
    %c0 = arith.constant 0 : index
    %c0_0 = arith.constant 0 : index
    %0 = vector.load %arg0[%c0, %c0_0] : memref<4x8xf32, #tpu.memory_space<vmem>>, vector<4x8xf32>
    %c0_1 = arith.constant 0 : index
    %c0_2 = arith.constant 0 : index
    %1 = vector.load %arg1[%c0_1, %c0_2] : memref<32x128xf32, #tpu.memory_space<vmem>>, vector<32x128xf32>
    %c0_3 = arith.constant 0 : index
    %c0_4 = arith.constant 0 : index
    %2 = vector.load %arg2[%c0_3, %c0_4] : memref<1x128xf32, #tpu.memory_space<vmem>>, vector<1x128xf32>
    %c0_5 = arith.constant 0 : index
    %c0_6 = arith.constant 0 : index
    %3 = vector.load %arg3[%c0_5, %c0_6] : memref<1x128xf32, #tpu.memory_space<vmem>>, vector<1x128xf32>
    %4 = tpu.iota {dimensions = array<i32: 1>} : vector<1x128xi32>
    %c96_i32 = arith.constant 96 : i32
    %5 = vector.broadcast %c96_i32 : i32 to vector<1x128xi32>
    %6 = arith.cmpi slt, %4, %5 : vector<1x128xi32>
    %cst = arith.constant 5.000000e-01 : f32
    %cst_7 = arith.constant 1.000000e+00 : f32
    %7 = vector.broadcast %cst : f32 to vector<1x128xf32>
    %8 = vector.broadcast %cst_7 : f32 to vector<1x128xf32>
    %9 = arith.select %6, %7, %8 : vector<1x128xi1>, vector<1x128xf32>
    %c96_i32_8 = arith.constant 96 : i32
    %10 = vector.broadcast %c96_i32_8 : i32 to vector<1x128xi32>
    %11 = arith.cmpi slt, %4, %10 : vector<1x128xi32>
    %cst_9 = arith.constant 5.000000e-01 : f32
    %cst_10 = arith.constant 0.000000e+00 : f32
    %12 = vector.broadcast %cst_9 : f32 to vector<1x128xf32>
    %13 = vector.broadcast %cst_10 : f32 to vector<1x128xf32>
    %14 = arith.select %11, %12, %13 : vector<1x128xi1>, vector<1x128xf32>
    %15 = tpu.iota {dimensions = array<i32: 1>} : vector<1x32xi32>
    %c16_i32 = arith.constant 16 : i32
    %16 = vector.broadcast %c16_i32 : i32 to vector<1x32xi32>
    %17 = arith.cmpi slt, %15, %16 : vector<1x32xi32>
    %cst_11 = arith.constant 1.000000e+00 : f32
    %cst_12 = arith.constant 0.000000e+00 : f32
    %18 = vector.broadcast %cst_11 : f32 to vector<1x32xf32>
    %19 = vector.broadcast %cst_12 : f32 to vector<1x32xf32>
    %20 = arith.select %17, %18, %19 : vector<1x32xi1>, vector<1x32xf32>
    %21 = vector.extract_strided_slice %0 {offsets = [0, 0], sizes = [4, 1], strides = [1, 1]} : vector<4x8xf32> to vector<4x1xf32>
    %22 = vector.broadcast %21 : vector<4x1xf32> to vector<4x128xf32>
    %23 = vector.broadcast %2 : vector<1x128xf32> to vector<4x128xf32>
    %24 = arith.mulf %22, %23 : vector<4x128xf32>
    %25 = vector.broadcast %3 : vector<1x128xf32> to vector<4x128xf32>
    %26 = arith.addf %24, %25 : vector<4x128xf32>
    %27 = vector.extract_strided_slice %0 {offsets = [0, 1], sizes = [4, 1], strides = [1, 1]} : vector<4x8xf32> to vector<4x1xf32>
    %28 = vector.broadcast %27 : vector<4x1xf32> to vector<4x128xf32>
    %29 = vector.broadcast %2 : vector<1x128xf32> to vector<4x128xf32>
    %30 = arith.mulf %28, %29 : vector<4x128xf32>
    %31 = vector.broadcast %3 : vector<1x128xf32> to vector<4x128xf32>
    %32 = arith.addf %30, %31 : vector<4x128xf32>
    %33 = vector.extract_strided_slice %0 {offsets = [0, 2], sizes = [4, 1], strides = [1, 1]} : vector<4x8xf32> to vector<4x1xf32>
    %34 = vector.broadcast %33 : vector<4x1xf32> to vector<4x128xf32>
    %35 = vector.broadcast %2 : vector<1x128xf32> to vector<4x128xf32>
    %36 = arith.mulf %34, %35 : vector<4x128xf32>
    %37 = vector.broadcast %3 : vector<1x128xf32> to vector<4x128xf32>
    %38 = arith.addf %36, %37 : vector<4x128xf32>
    %39 = vector.extract_strided_slice %0 {offsets = [0, 3], sizes = [4, 1], strides = [1, 1]} : vector<4x8xf32> to vector<4x1xf32>
    %40 = vector.broadcast %39 : vector<4x1xf32> to vector<4x128xf32>
    %41 = vector.broadcast %2 : vector<1x128xf32> to vector<4x128xf32>
    %42 = arith.mulf %40, %41 : vector<4x128xf32>
    %43 = vector.broadcast %3 : vector<1x128xf32> to vector<4x128xf32>
    %44 = arith.addf %42, %43 : vector<4x128xf32>
    %45 = vector.extract_strided_slice %0 {offsets = [0, 4], sizes = [4, 1], strides = [1, 1]} : vector<4x8xf32> to vector<4x1xf32>
    %46 = vector.broadcast %45 : vector<4x1xf32> to vector<4x128xf32>
    %47 = vector.broadcast %2 : vector<1x128xf32> to vector<4x128xf32>
    %48 = arith.mulf %46, %47 : vector<4x128xf32>
    %49 = vector.broadcast %3 : vector<1x128xf32> to vector<4x128xf32>
    %50 = arith.addf %48, %49 : vector<4x128xf32>
    %51 = vector.extract_strided_slice %0 {offsets = [0, 5], sizes = [4, 1], strides = [1, 1]} : vector<4x8xf32> to vector<4x1xf32>
    %52 = vector.broadcast %51 : vector<4x1xf32> to vector<4x128xf32>
    %53 = vector.broadcast %2 : vector<1x128xf32> to vector<4x128xf32>
    %54 = arith.mulf %52, %53 : vector<4x128xf32>
    %55 = vector.broadcast %3 : vector<1x128xf32> to vector<4x128xf32>
    %56 = arith.addf %54, %55 : vector<4x128xf32>
    %57 = vector.extract_strided_slice %0 {offsets = [0, 6], sizes = [4, 1], strides = [1, 1]} : vector<4x8xf32> to vector<4x1xf32>
    %58 = vector.broadcast %57 : vector<4x1xf32> to vector<4x128xf32>
    %59 = vector.broadcast %2 : vector<1x128xf32> to vector<4x128xf32>
    %60 = arith.mulf %58, %59 : vector<4x128xf32>
    %61 = vector.broadcast %3 : vector<1x128xf32> to vector<4x128xf32>
    %62 = arith.addf %60, %61 : vector<4x128xf32>
    %63 = vector.extract_strided_slice %0 {offsets = [0, 7], sizes = [4, 1], strides = [1, 1]} : vector<4x8xf32> to vector<4x1xf32>
    %64 = vector.broadcast %63 : vector<4x1xf32> to vector<4x128xf32>
    %65 = vector.broadcast %2 : vector<1x128xf32> to vector<4x128xf32>
    %66 = arith.mulf %64, %65 : vector<4x128xf32>
    %67 = vector.broadcast %3 : vector<1x128xf32> to vector<4x128xf32>
    %68 = arith.addf %66, %67 : vector<4x128xf32>
    %cst_13 = arith.constant 0.000000e+00 : f32
    %69 = vector.broadcast %cst_13 : f32 to vector<4x32xf32>
    %cst_14 = arith.constant 0.000000e+00 : f32
    %70 = vector.broadcast %cst_14 : f32 to vector<4x32xf32>
    %cst_15 = arith.constant dense<0.000000e+00> : vector<4x128xf32>
    %71 = tpu.matmul %69, %1, %cst_15 {dimension_numbers = #tpu.dot_dimension_numbers<[1], [0], [0], [1], [0, 0, 1, 1], [], []>} : vector<4x32xf32>, vector<32x128xf32>, vector<4x128xf32> -> vector<4x128xf32>
    %72 = arith.addf %71, %26 : vector<4x128xf32>
    %73 = math.tanh %72 : vector<4x128xf32>
    %74 = vector.broadcast %9 : vector<1x128xf32> to vector<4x128xf32>
    %75 = arith.mulf %73, %74 : vector<4x128xf32>
    %76 = vector.broadcast %14 : vector<1x128xf32> to vector<4x128xf32>
    %77 = arith.addf %75, %76 : vector<4x128xf32>
    %78 = vector.extract_strided_slice %77 {offsets = [0, 0], sizes = [4, 32], strides = [1, 1]} : vector<4x128xf32> to vector<4x32xf32>
    %79 = vector.extract_strided_slice %77 {offsets = [0, 32], sizes = [4, 32], strides = [1, 1]} : vector<4x128xf32> to vector<4x32xf32>
    %80 = vector.extract_strided_slice %77 {offsets = [0, 64], sizes = [4, 32], strides = [1, 1]} : vector<4x128xf32> to vector<4x32xf32>
    %81 = vector.extract_strided_slice %77 {offsets = [0, 96], sizes = [4, 32], strides = [1, 1]} : vector<4x128xf32> to vector<4x32xf32>
    %82 = arith.mulf %79, %70 : vector<4x32xf32>
    %83 = arith.mulf %78, %81 : vector<4x32xf32>
    %84 = arith.addf %82, %83 : vector<4x32xf32>
    %85 = math.tanh %84 : vector<4x32xf32>
    %86 = arith.mulf %80, %85 : vector<4x32xf32>
    %87 = vector.broadcast %20 : vector<1x32xf32> to vector<4x32xf32>
    %88 = arith.mulf %86, %87 : vector<4x32xf32>
    %89 = vector.broadcast %20 : vector<1x32xf32> to vector<4x32xf32>
    %90 = arith.mulf %84, %89 : vector<4x32xf32>
    %cst_16 = arith.constant dense<0.000000e+00> : vector<4x128xf32>
    %91 = tpu.matmul %88, %1, %cst_16 {dimension_numbers = #tpu.dot_dimension_numbers<[1], [0], [0], [1], [0, 0, 1, 1], [], []>} : vector<4x32xf32>, vector<32x128xf32>, vector<4x128xf32> -> vector<4x128xf32>
    %92 = arith.addf %91, %32 : vector<4x128xf32>
    %93 = math.tanh %92 : vector<4x128xf32>
    %94 = vector.broadcast %9 : vector<1x128xf32> to vector<4x128xf32>
    %95 = arith.mulf %93, %94 : vector<4x128xf32>
    %96 = vector.broadcast %14 : vector<1x128xf32> to vector<4x128xf32>
    %97 = arith.addf %95, %96 : vector<4x128xf32>
    %98 = vector.extract_strided_slice %97 {offsets = [0, 0], sizes = [4, 32], strides = [1, 1]} : vector<4x128xf32> to vector<4x32xf32>
    %99 = vector.extract_strided_slice %97 {offsets = [0, 32], sizes = [4, 32], strides = [1, 1]} : vector<4x128xf32> to vector<4x32xf32>
    %100 = vector.extract_strided_slice %97 {offsets = [0, 64], sizes = [4, 32], strides = [1, 1]} : vector<4x128xf32> to vector<4x32xf32>
    %101 = vector.extract_strided_slice %97 {offsets = [0, 96], sizes = [4, 32], strides = [1, 1]} : vector<4x128xf32> to vector<4x32xf32>
    %102 = arith.mulf %99, %90 : vector<4x32xf32>
    %103 = arith.mulf %98, %101 : vector<4x32xf32>
    %104 = arith.addf %102, %103 : vector<4x32xf32>
    %105 = math.tanh %104 : vector<4x32xf32>
    %106 = arith.mulf %100, %105 : vector<4x32xf32>
    %c0_17 = arith.constant 0 : index
    %c0_18 = arith.constant 0 : index
    %107 = vector.load %arg11[%c0_17, %c0_18] : memref<32x32xf32, #tpu.memory_space<vmem>>, vector<4x32xf32>
    tpu.vector_store %arg11[%c0_17, %c0_18], %106 {strides = array<i32>} : memref<32x32xf32, #tpu.memory_space<vmem>>, vector<4x32xf32>,
    %cst_19 = arith.constant dense<0.000000e+00> : vector<4x128xf32>
    %108 = tpu.matmul %106, %1, %cst_19 {dimension_numbers = #tpu.dot_dimension_numbers<[1], [0], [0], [1], [0, 0, 1, 1], [], []>} : vector<4x32xf32>, vector<32x128xf32>, vector<4x128xf32> -> vector<4x128xf32>
    %109 = arith.addf %108, %38 : vector<4x128xf32>
    %110 = math.tanh %109 : vector<4x128xf32>
    %111 = vector.broadcast %9 : vector<1x128xf32> to vector<4x128xf32>
    %112 = arith.mulf %110, %111 : vector<4x128xf32>
    %113 = vector.broadcast %14 : vector<1x128xf32> to vector<4x128xf32>
    %114 = arith.addf %112, %113 : vector<4x128xf32>
    %115 = vector.extract_strided_slice %114 {offsets = [0, 0], sizes = [4, 32], strides = [1, 1]} : vector<4x128xf32> to vector<4x32xf32>
    %116 = vector.extract_strided_slice %114 {offsets = [0, 32], sizes = [4, 32], strides = [1, 1]} : vector<4x128xf32> to vector<4x32xf32>
    %117 = vector.extract_strided_slice %114 {offsets = [0, 64], sizes = [4, 32], strides = [1, 1]} : vector<4x128xf32> to vector<4x32xf32>
    %118 = vector.extract_strided_slice %114 {offsets = [0, 96], sizes = [4, 32], strides = [1, 1]} : vector<4x128xf32> to vector<4x32xf32>
    %119 = arith.mulf %116, %104 : vector<4x32xf32>
    %120 = arith.mulf %115, %118 : vector<4x32xf32>
    %121 = arith.addf %119, %120 : vector<4x32xf32>
    %122 = math.tanh %121 : vector<4x32xf32>
    %123 = arith.mulf %117, %122 : vector<4x32xf32>
    %c4 = arith.constant 4 : index
    %c0_20 = arith.constant 0 : index
    %124 = vector.load %arg11[%c4, %c0_20] : memref<32x32xf32, #tpu.memory_space<vmem>>, vector<4x32xf32>
    tpu.vector_store %arg11[%c4, %c0_20], %123 {strides = array<i32>} : memref<32x32xf32, #tpu.memory_space<vmem>>, vector<4x32xf32>,
    %cst_21 = arith.constant dense<0.000000e+00> : vector<4x128xf32>
    %125 = tpu.matmul %123, %1, %cst_21 {dimension_numbers = #tpu.dot_dimension_numbers<[1], [0], [0], [1], [0, 0, 1, 1], [], []>} : vector<4x32xf32>, vector<32x128xf32>, vector<4x128xf32> -> vector<4x128xf32>
    %126 = arith.addf %125, %44 : vector<4x128xf32>
    %127 = math.tanh %126 : vector<4x128xf32>
    %128 = vector.broadcast %9 : vector<1x128xf32> to vector<4x128xf32>
    %129 = arith.mulf %127, %128 : vector<4x128xf32>
    %130 = vector.broadcast %14 : vector<1x128xf32> to vector<4x128xf32>
    %131 = arith.addf %129, %130 : vector<4x128xf32>
    %132 = vector.extract_strided_slice %131 {offsets = [0, 0], sizes = [4, 32], strides = [1, 1]} : vector<4x128xf32> to vector<4x32xf32>
    %133 = vector.extract_strided_slice %131 {offsets = [0, 32], sizes = [4, 32], strides = [1, 1]} : vector<4x128xf32> to vector<4x32xf32>
    %134 = vector.extract_strided_slice %131 {offsets = [0, 64], sizes = [4, 32], strides = [1, 1]} : vector<4x128xf32> to vector<4x32xf32>
    %135 = vector.extract_strided_slice %131 {offsets = [0, 96], sizes = [4, 32], strides = [1, 1]} : vector<4x128xf32> to vector<4x32xf32>
    %136 = arith.mulf %133, %121 : vector<4x32xf32>
    %137 = arith.mulf %132, %135 : vector<4x32xf32>
    %138 = arith.addf %136, %137 : vector<4x32xf32>
    %139 = math.tanh %138 : vector<4x32xf32>
    %140 = arith.mulf %134, %139 : vector<4x32xf32>
    %c8 = arith.constant 8 : index
    %c0_22 = arith.constant 0 : index
    %141 = vector.load %arg11[%c8, %c0_22] : memref<32x32xf32, #tpu.memory_space<vmem>>, vector<4x32xf32>
    tpu.vector_store %arg11[%c8, %c0_22], %140 {strides = array<i32>} : memref<32x32xf32, #tpu.memory_space<vmem>>, vector<4x32xf32>,
    %cst_23 = arith.constant dense<0.000000e+00> : vector<4x128xf32>
    %142 = tpu.matmul %140, %1, %cst_23 {dimension_numbers = #tpu.dot_dimension_numbers<[1], [0], [0], [1], [0, 0, 1, 1], [], []>} : vector<4x32xf32>, vector<32x128xf32>, vector<4x128xf32> -> vector<4x128xf32>
    %143 = arith.addf %142, %50 : vector<4x128xf32>
    %144 = math.tanh %143 : vector<4x128xf32>
    %145 = vector.broadcast %9 : vector<1x128xf32> to vector<4x128xf32>
    %146 = arith.mulf %144, %145 : vector<4x128xf32>
    %147 = vector.broadcast %14 : vector<1x128xf32> to vector<4x128xf32>
    %148 = arith.addf %146, %147 : vector<4x128xf32>
    %149 = vector.extract_strided_slice %148 {offsets = [0, 0], sizes = [4, 32], strides = [1, 1]} : vector<4x128xf32> to vector<4x32xf32>
    %150 = vector.extract_strided_slice %148 {offsets = [0, 32], sizes = [4, 32], strides = [1, 1]} : vector<4x128xf32> to vector<4x32xf32>
    %151 = vector.extract_strided_slice %148 {offsets = [0, 64], sizes = [4, 32], strides = [1, 1]} : vector<4x128xf32> to vector<4x32xf32>
    %152 = vector.extract_strided_slice %148 {offsets = [0, 96], sizes = [4, 32], strides = [1, 1]} : vector<4x128xf32> to vector<4x32xf32>
    %153 = arith.mulf %150, %138 : vector<4x32xf32>
    %154 = arith.mulf %149, %152 : vector<4x32xf32>
    %155 = arith.addf %153, %154 : vector<4x32xf32>
    %156 = math.tanh %155 : vector<4x32xf32>
    %157 = arith.mulf %151, %156 : vector<4x32xf32>
    %c12 = arith.constant 12 : index
    %c0_24 = arith.constant 0 : index
    %158 = vector.load %arg11[%c12, %c0_24] : memref<32x32xf32, #tpu.memory_space<vmem>>, vector<4x32xf32>
    tpu.vector_store %arg11[%c12, %c0_24], %157 {strides = array<i32>} : memref<32x32xf32, #tpu.memory_space<vmem>>, vector<4x32xf32>,
    %cst_25 = arith.constant dense<0.000000e+00> : vector<4x128xf32>
    %159 = tpu.matmul %157, %1, %cst_25 {dimension_numbers = #tpu.dot_dimension_numbers<[1], [0], [0], [1], [0, 0, 1, 1], [], []>} : vector<4x32xf32>, vector<32x128xf32>, vector<4x128xf32> -> vector<4x128xf32>
    %160 = arith.addf %159, %56 : vector<4x128xf32>
    %161 = math.tanh %160 : vector<4x128xf32>
    %162 = vector.broadcast %9 : vector<1x128xf32> to vector<4x128xf32>
    %163 = arith.mulf %161, %162 : vector<4x128xf32>
    %164 = vector.broadcast %14 : vector<1x128xf32> to vector<4x128xf32>
    %165 = arith.addf %163, %164 : vector<4x128xf32>
    %166 = vector.extract_strided_slice %165 {offsets = [0, 0], sizes = [4, 32], strides = [1, 1]} : vector<4x128xf32> to vector<4x32xf32>
    %167 = vector.extract_strided_slice %165 {offsets = [0, 32], sizes = [4, 32], strides = [1, 1]} : vector<4x128xf32> to vector<4x32xf32>
    %168 = vector.extract_strided_slice %165 {offsets = [0, 64], sizes = [4, 32], strides = [1, 1]} : vector<4x128xf32> to vector<4x32xf32>
    %169 = vector.extract_strided_slice %165 {offsets = [0, 96], sizes = [4, 32], strides = [1, 1]} : vector<4x128xf32> to vector<4x32xf32>
    %170 = arith.mulf %167, %155 : vector<4x32xf32>
    %171 = arith.mulf %166, %169 : vector<4x32xf32>
    %172 = arith.addf %170, %171 : vector<4x32xf32>
    %173 = math.tanh %172 : vector<4x32xf32>
    %174 = arith.mulf %168, %173 : vector<4x32xf32>
    %c16 = arith.constant 16 : index
    %c0_26 = arith.constant 0 : index
    %175 = vector.load %arg11[%c16, %c0_26] : memref<32x32xf32, #tpu.memory_space<vmem>>, vector<4x32xf32>
    tpu.vector_store %arg11[%c16, %c0_26], %174 {strides = array<i32>} : memref<32x32xf32, #tpu.memory_space<vmem>>, vector<4x32xf32>,
    %cst_27 = arith.constant dense<0.000000e+00> : vector<4x128xf32>
    %176 = tpu.matmul %174, %1, %cst_27 {dimension_numbers = #tpu.dot_dimension_numbers<[1], [0], [0], [1], [0, 0, 1, 1], [], []>} : vector<4x32xf32>, vector<32x128xf32>, vector<4x128xf32> -> vector<4x128xf32>
    %177 = arith.addf %176, %62 : vector<4x128xf32>
    %178 = math.tanh %177 : vector<4x128xf32>
    %179 = vector.broadcast %9 : vector<1x128xf32> to vector<4x128xf32>
    %180 = arith.mulf %178, %179 : vector<4x128xf32>
    %181 = vector.broadcast %14 : vector<1x128xf32> to vector<4x128xf32>
    %182 = arith.addf %180, %181 : vector<4x128xf32>
    %183 = vector.extract_strided_slice %182 {offsets = [0, 0], sizes = [4, 32], strides = [1, 1]} : vector<4x128xf32> to vector<4x32xf32>
    %184 = vector.extract_strided_slice %182 {offsets = [0, 32], sizes = [4, 32], strides = [1, 1]} : vector<4x128xf32> to vector<4x32xf32>
    %185 = vector.extract_strided_slice %182 {offsets = [0, 64], sizes = [4, 32], strides = [1, 1]} : vector<4x128xf32> to vector<4x32xf32>
    %186 = vector.extract_strided_slice %182 {offsets = [0, 96], sizes = [4, 32], strides = [1, 1]} : vector<4x128xf32> to vector<4x32xf32>
    %187 = arith.mulf %184, %172 : vector<4x32xf32>
    %188 = arith.mulf %183, %186 : vector<4x32xf32>
    %189 = arith.addf %187, %188 : vector<4x32xf32>
    %190 = math.tanh %189 : vector<4x32xf32>
    %191 = arith.mulf %185, %190 : vector<4x32xf32>
    %c20 = arith.constant 20 : index
    %c0_28 = arith.constant 0 : index
    %192 = vector.load %arg11[%c20, %c0_28] : memref<32x32xf32, #tpu.memory_space<vmem>>, vector<4x32xf32>
    tpu.vector_store %arg11[%c20, %c0_28], %191 {strides = array<i32>} : memref<32x32xf32, #tpu.memory_space<vmem>>, vector<4x32xf32>,
    %cst_29 = arith.constant dense<0.000000e+00> : vector<4x128xf32>
    %193 = tpu.matmul %191, %1, %cst_29 {dimension_numbers = #tpu.dot_dimension_numbers<[1], [0], [0], [1], [0, 0, 1, 1], [], []>} : vector<4x32xf32>, vector<32x128xf32>, vector<4x128xf32> -> vector<4x128xf32>
    %194 = arith.addf %193, %68 : vector<4x128xf32>
    %195 = math.tanh %194 : vector<4x128xf32>
    %196 = vector.broadcast %9 : vector<1x128xf32> to vector<4x128xf32>
    %197 = arith.mulf %195, %196 : vector<4x128xf32>
    %198 = vector.broadcast %14 : vector<1x128xf32> to vector<4x128xf32>
    %199 = arith.addf %197, %198 : vector<4x128xf32>
    %200 = vector.extract_strided_slice %199 {offsets = [0, 0], sizes = [4, 32], strides = [1, 1]} : vector<4x128xf32> to vector<4x32xf32>
    %201 = vector.extract_strided_slice %199 {offsets = [0, 32], sizes = [4, 32], strides = [1, 1]} : vector<4x128xf32> to vector<4x32xf32>
    %202 = vector.extract_strided_slice %199 {offsets = [0, 64], sizes = [4, 32], strides = [1, 1]} : vector<4x128xf32> to vector<4x32xf32>
    %203 = vector.extract_strided_slice %199 {offsets = [0, 96], sizes = [4, 32], strides = [1, 1]} : vector<4x128xf32> to vector<4x32xf32>
    %204 = arith.mulf %201, %189 : vector<4x32xf32>
    %205 = arith.mulf %200, %203 : vector<4x32xf32>
    %206 = arith.addf %204, %205 : vector<4x32xf32>
    %207 = math.tanh %206 : vector<4x32xf32>
    %208 = arith.mulf %202, %207 : vector<4x32xf32>
    %c24 = arith.constant 24 : index
    %c0_30 = arith.constant 0 : index
    %209 = vector.load %arg11[%c24, %c0_30] : memref<32x32xf32, #tpu.memory_space<vmem>>, vector<4x32xf32>
    tpu.vector_store %arg11[%c24, %c0_30], %208 {strides = array<i32>} : memref<32x32xf32, #tpu.memory_space<vmem>>, vector<4x32xf32>,
    %cst_31 = arith.constant dense<0.000000e+00> : vector<4x128xf32>
    %210 = tpu.matmul %208, %1, %cst_31 {dimension_numbers = #tpu.dot_dimension_numbers<[1], [0], [0], [1], [0, 0, 1, 1], [], []>} : vector<4x32xf32>, vector<32x128xf32>, vector<4x128xf32> -> vector<4x128xf32>
    %211 = vector.broadcast %3 : vector<1x128xf32> to vector<4x128xf32>
    %212 = arith.addf %210, %211 : vector<4x128xf32>
    %213 = math.tanh %212 : vector<4x128xf32>
    %214 = vector.broadcast %9 : vector<1x128xf32> to vector<4x128xf32>
    %215 = arith.mulf %213, %214 : vector<4x128xf32>
    %216 = vector.broadcast %14 : vector<1x128xf32> to vector<4x128xf32>
    %217 = arith.addf %215, %216 : vector<4x128xf32>
    %218 = vector.extract_strided_slice %217 {offsets = [0, 0], sizes = [4, 32], strides = [1, 1]} : vector<4x128xf32> to vector<4x32xf32>
    %219 = vector.extract_strided_slice %217 {offsets = [0, 32], sizes = [4, 32], strides = [1, 1]} : vector<4x128xf32> to vector<4x32xf32>
    %220 = vector.extract_strided_slice %217 {offsets = [0, 64], sizes = [4, 32], strides = [1, 1]} : vector<4x128xf32> to vector<4x32xf32>
    %221 = vector.extract_strided_slice %217 {offsets = [0, 96], sizes = [4, 32], strides = [1, 1]} : vector<4x128xf32> to vector<4x32xf32>
    %222 = arith.mulf %219, %206 : vector<4x32xf32>
    %223 = arith.mulf %218, %221 : vector<4x32xf32>
    %224 = arith.addf %222, %223 : vector<4x32xf32>
    %225 = math.tanh %224 : vector<4x32xf32>
    %226 = arith.mulf %220, %225 : vector<4x32xf32>
    %c28 = arith.constant 28 : index
    %c0_32 = arith.constant 0 : index
    %227 = vector.load %arg11[%c28, %c0_32] : memref<32x32xf32, #tpu.memory_space<vmem>>, vector<4x32xf32>
    tpu.vector_store %arg11[%c28, %c0_32], %226 {strides = array<i32>} : memref<32x32xf32, #tpu.memory_space<vmem>>, vector<4x32xf32>,
    %c0_33 = arith.constant 0 : index
    %c0_34 = arith.constant 0 : index
    %228 = vector.load %arg11[%c0_33, %c0_34] : memref<32x32xf32, #tpu.memory_space<vmem>>, vector<32x32xf32>
    %c0_35 = arith.constant 0 : index
    %c0_36 = arith.constant 0 : index
    %229 = vector.load %arg4[%c0_35, %c0_36] : memref<32x32xf32, #tpu.memory_space<vmem>>, vector<32x32xf32>
    %cst_37 = arith.constant dense<0.000000e+00> : vector<32x32xf32>
    %230 = tpu.matmul %228, %229, %cst_37 {dimension_numbers = #tpu.dot_dimension_numbers<[1], [0], [0], [1], [0, 0, 1, 1], [], []>} : vector<32x32xf32>, vector<32x32xf32>, vector<32x32xf32> -> vector<32x32xf32>
    %c0_38 = arith.constant 0 : index
    %c0_39 = arith.constant 0 : index
    %231 = vector.load %arg5[%c0_38, %c0_39] : memref<1x32xf32, #tpu.memory_space<vmem>>, vector<1x32xf32>
    %232 = vector.broadcast %231 : vector<1x32xf32> to vector<32x32xf32>
    %233 = arith.addf %230, %232 : vector<32x32xf32>
    %cst_40 = arith.constant dense<0.000000e+00> : vector<32xf32>
    %234 = vector.multi_reduction <add>, %233, %cst_40 [0] : vector<32x32xf32> to vector<32xf32>
    %235 = vector.shape_cast %234 : vector<32xf32> to vector<1x32xf32>
    %cst_41 = arith.constant 3.200000e+01 : f32
    %236 = vector.broadcast %cst_41 : f32 to vector<1x32xf32>
    %237 = arith.divf %235, %236 : vector<1x32xf32>
    %238 = arith.mulf %233, %233 : vector<32x32xf32>
    %cst_42 = arith.constant dense<0.000000e+00> : vector<32xf32>
    %239 = vector.multi_reduction <add>, %238, %cst_42 [0] : vector<32x32xf32> to vector<32xf32>
    %240 = vector.shape_cast %239 : vector<32xf32> to vector<1x32xf32>
    %cst_43 = arith.constant 3.200000e+01 : f32
    %241 = vector.broadcast %cst_43 : f32 to vector<1x32xf32>
    %242 = arith.divf %240, %241 : vector<1x32xf32>
    %243 = arith.mulf %237, %237 : vector<1x32xf32>
    %244 = arith.subf %242, %243 : vector<1x32xf32>
    %cst_44 = arith.constant 0.000000e+00 : f32
    %245 = vector.broadcast %cst_44 : f32 to vector<1x32xf32>
    %246 = arith.maximumf %244, %245 : vector<1x32xf32>
    %247 = vector.broadcast %237 : vector<1x32xf32> to vector<32x32xf32>
    %248 = arith.subf %233, %247 : vector<32x32xf32>
    %cst_45 = arith.constant 9.99999974E-6 : f32
    %249 = vector.broadcast %cst_45 : f32 to vector<1x32xf32>
    %250 = arith.addf %246, %249 : vector<1x32xf32>
    %251 = math.rsqrt %250 : vector<1x32xf32>
    %252 = vector.broadcast %251 : vector<1x32xf32> to vector<32x32xf32>
    %253 = arith.mulf %248, %252 : vector<32x32xf32>
    %c0_46 = arith.constant 0 : index
    %c0_47 = arith.constant 0 : index
    %254 = vector.load %arg6[%c0_46, %c0_47] : memref<1x32xf32, #tpu.memory_space<vmem>>, vector<1x32xf32>
    %255 = vector.broadcast %254 : vector<1x32xf32> to vector<32x32xf32>
    %256 = arith.mulf %253, %255 : vector<32x32xf32>
    %c0_48 = arith.constant 0 : index
    %c0_49 = arith.constant 0 : index
    %257 = vector.load %arg7[%c0_48, %c0_49] : memref<1x32xf32, #tpu.memory_space<vmem>>, vector<1x32xf32>
    %258 = vector.broadcast %257 : vector<1x32xf32> to vector<32x32xf32>
    %259 = arith.addf %256, %258 : vector<32x32xf32>
    %cst_50 = arith.constant 0.000000e+00 : f32
    %260 = vector.broadcast %cst_50 : f32 to vector<32x32xf32>
    %261 = arith.maximumf %259, %260 : vector<32x32xf32>
    %c0_51 = arith.constant 0 : index
    %c0_52 = arith.constant 0 : index
    %262 = vector.load %arg8[%c0_51, %c0_52] : memref<1x32xf32, #tpu.memory_space<vmem>>, vector<1x32xf32>
    %263 = vector.broadcast %262 : vector<1x32xf32> to vector<32x32xf32>
    %264 = arith.mulf %261, %263 : vector<32x32xf32>
    %cst_53 = arith.constant dense<0.000000e+00> : vector<32xf32>
    %265 = vector.multi_reduction <add>, %264, %cst_53 [1] : vector<32x32xf32> to vector<32xf32>
    %266 = vector.shape_cast %265 : vector<32xf32> to vector<32x1xf32>
    %c0_54 = arith.constant 0 : index
    %c0_55 = arith.constant 0 : index
    %267 = vector.load %arg9[%c0_54, %c0_55] : memref<1x1xf32, #tpu.memory_space<vmem>>, vector<1x1xf32>
    %268 = vector.broadcast %267 : vector<1x1xf32> to vector<32x1xf32>
    %269 = arith.addf %266, %268 : vector<32x1xf32>
    %270 = tpu.iota {dimensions = array<i32: 1>} : vector<4x8xi32>
    %cst_56 = arith.constant 0.000000e+00 : f32
    %271 = vector.broadcast %cst_56 : f32 to vector<4x8xf32>
    %c0_i32 = arith.constant 0 : i32
    %272 = vector.broadcast %c0_i32 : i32 to vector<4x8xi32>
    %273 = arith.cmpi eq, %270, %272 : vector<4x8xi32>
    %274 = vector.extract_strided_slice %269 {offsets = [0, 0], sizes = [4, 1], strides = [1, 1]} : vector<32x1xf32> to vector<4x1xf32>
    %275 = vector.shape_cast %274 : vector<4x1xf32> to vector<4x1xf32>
    %276 = vector.broadcast %275 : vector<4x1xf32> to vector<4x8xf32>
    %277 = arith.select %273, %276, %271 : vector<4x8xi1>, vector<4x8xf32>
    %c1_i32 = arith.constant 1 : i32
    %278 = vector.broadcast %c1_i32 : i32 to vector<4x8xi32>
    %279 = arith.cmpi eq, %270, %278 : vector<4x8xi32>
    %280 = vector.extract_strided_slice %269 {offsets = [4, 0], sizes = [4, 1], strides = [1, 1]} : vector<32x1xf32> to vector<4x1xf32>
    %281 = vector.shape_cast %280 : vector<4x1xf32> to vector<4x1xf32>
    %282 = vector.broadcast %281 : vector<4x1xf32> to vector<4x8xf32>
    %283 = arith.select %279, %282, %277 : vector<4x8xi1>, vector<4x8xf32>
    %c2_i32 = arith.constant 2 : i32
    %284 = vector.broadcast %c2_i32 : i32 to vector<4x8xi32>
    %285 = arith.cmpi eq, %270, %284 : vector<4x8xi32>
    %286 = vector.extract_strided_slice %269 {offsets = [8, 0], sizes = [4, 1], strides = [1, 1]} : vector<32x1xf32> to vector<4x1xf32>
    %287 = vector.shape_cast %286 : vector<4x1xf32> to vector<4x1xf32>
    %288 = vector.broadcast %287 : vector<4x1xf32> to vector<4x8xf32>
    %289 = arith.select %285, %288, %283 : vector<4x8xi1>, vector<4x8xf32>
    %c3_i32 = arith.constant 3 : i32
    %290 = vector.broadcast %c3_i32 : i32 to vector<4x8xi32>
    %291 = arith.cmpi eq, %270, %290 : vector<4x8xi32>
    %292 = vector.extract_strided_slice %269 {offsets = [12, 0], sizes = [4, 1], strides = [1, 1]} : vector<32x1xf32> to vector<4x1xf32>
    %293 = vector.shape_cast %292 : vector<4x1xf32> to vector<4x1xf32>
    %294 = vector.broadcast %293 : vector<4x1xf32> to vector<4x8xf32>
    %295 = arith.select %291, %294, %289 : vector<4x8xi1>, vector<4x8xf32>
    %c4_i32 = arith.constant 4 : i32
    %296 = vector.broadcast %c4_i32 : i32 to vector<4x8xi32>
    %297 = arith.cmpi eq, %270, %296 : vector<4x8xi32>
    %298 = vector.extract_strided_slice %269 {offsets = [16, 0], sizes = [4, 1], strides = [1, 1]} : vector<32x1xf32> to vector<4x1xf32>
    %299 = vector.shape_cast %298 : vector<4x1xf32> to vector<4x1xf32>
    %300 = vector.broadcast %299 : vector<4x1xf32> to vector<4x8xf32>
    %301 = arith.select %297, %300, %295 : vector<4x8xi1>, vector<4x8xf32>
    %c5_i32 = arith.constant 5 : i32
    %302 = vector.broadcast %c5_i32 : i32 to vector<4x8xi32>
    %303 = arith.cmpi eq, %270, %302 : vector<4x8xi32>
    %304 = vector.extract_strided_slice %269 {offsets = [20, 0], sizes = [4, 1], strides = [1, 1]} : vector<32x1xf32> to vector<4x1xf32>
    %305 = vector.shape_cast %304 : vector<4x1xf32> to vector<4x1xf32>
    %306 = vector.broadcast %305 : vector<4x1xf32> to vector<4x8xf32>
    %307 = arith.select %303, %306, %301 : vector<4x8xi1>, vector<4x8xf32>
    %c6_i32 = arith.constant 6 : i32
    %308 = vector.broadcast %c6_i32 : i32 to vector<4x8xi32>
    %309 = arith.cmpi eq, %270, %308 : vector<4x8xi32>
    %310 = vector.extract_strided_slice %269 {offsets = [24, 0], sizes = [4, 1], strides = [1, 1]} : vector<32x1xf32> to vector<4x1xf32>
    %311 = vector.shape_cast %310 : vector<4x1xf32> to vector<4x1xf32>
    %312 = vector.broadcast %311 : vector<4x1xf32> to vector<4x8xf32>
    %313 = arith.select %309, %312, %307 : vector<4x8xi1>, vector<4x8xf32>
    %c7_i32 = arith.constant 7 : i32
    %314 = vector.broadcast %c7_i32 : i32 to vector<4x8xi32>
    %315 = arith.cmpi eq, %270, %314 : vector<4x8xi32>
    %316 = vector.extract_strided_slice %269 {offsets = [28, 0], sizes = [4, 1], strides = [1, 1]} : vector<32x1xf32> to vector<4x1xf32>
    %317 = vector.shape_cast %316 : vector<4x1xf32> to vector<4x1xf32>
    %318 = vector.broadcast %317 : vector<4x1xf32> to vector<4x8xf32>
    %319 = arith.select %315, %318, %313 : vector<4x8xi1>, vector<4x8xf32>
    %c0_57 = arith.constant 0 : index
    %c0_58 = arith.constant 0 : index
    %320 = vector.load %arg10[%c0_57, %c0_58] : memref<4x8xf32, #tpu.memory_space<vmem>>, vector<4x8xf32>
    tpu.vector_store %arg10[%c0_57, %c0_58], %319 {strides = array<i32>} : memref<4x8xf32, #tpu.memory_space<vmem>>, vector<4x8xf32>,
    return
  }
}

</mosaic_0001>

<bundles_post_ra>
// kernel: lstm_ts_forward.1
= control target key start
LH: loop header
LB: loop body
LE: loop exit
PB: predicated region body
PF: predicated region fallthrough
CT: control target
= control target key end

     0   :  { %s1329_s0 = inlined_call_operand.hbm [shape: f32[4,8], index: 0, kind: input, shape index: {}]   ;;  %s1330_s1 = inlined_call_operand.hbm [shape: f32[32,128], index: 1, kind: input, shape index: {}]   ;;  %s1331_s2 = inlined_call_operand.vmem [shape: f32[1,128], index: 2, kind: input, shape index: {}]   ;;  %s1332_s3 = inlined_call_operand.vmem [shape: f32[1,128], index: 3, kind: input, shape index: {}]   ;;  %s1333_s4 = inlined_call_operand.hbm [shape: f32[32,32], index: 4, kind: input, shape index: {}]   ;;  %s1334_s5 = inlined_call_operand.vmem [shape: f32[1,32], index: 5, kind: input, shape index: {}]   ;;  %s1335_s6 = inlined_call_operand.vmem [shape: f32[1,32], index: 6, kind: input, shape index: {}]   ;;  %s1336_s7 = inlined_call_operand.hbm [shape: f32[1,32], index: 7, kind: input, shape index: {}]   ;;  %s1337_s8 = inlined_call_operand.vmem [shape: f32[1,32], index: 8, kind: input, shape index: {}]   ;;  %s1338_s9 = inlined_call_operand.<no memory space> [shape: f32[1,1], index: 9, kind: input, shape index: {}]   ;;  %s1339_s10 = inlined_call_operand.vmem [shape: f32[4,8], index: 10, kind: output, shape index: {}]  }
   0x1   :  { %v15_v0 = vstv %s1338_s9 }
   0x2   :  { %16 = vst [vmem:[#allocation3] sm:$0x1] %v15_v0 }
   0x3   :  { %17 = vsyncpa [#allocation5], 0 }
   0x4   :  { %18 = vsyncpa [#allocation7], 0  ;;  %s35_s17 = sshll.u32 %s1330_s1, 4  ;;  %s36_s17 = int_to_ptr.hbm [resolvable:$true] %s35_s17 }
   0x5   :  { %19 = vsyncpa [#allocation10], 0  ;;  %s1021_s18 = smov [#allocation6]   ;;  %s25_s22 = sshll.u32 %s1329_s0, 4  ;;  %s26_s22 = int_to_ptr.hbm [resolvable:$true] %s25_s22 }
   0x6   :  { %s37_s19 = sshll.u32 %s1021_s18, 4  ;;  %s1022_s23 = smov 128   ;;  %s38_s19 = int_to_ptr.vmem [resolvable:$true] %s37_s19 }
   0x7   :  { %s1023_s24 = smov 8   ;;  %s1024_s9 = smov [#allocation4]  }
   0x8   :  { %43 = dma.hbm_to_vmem [thread:$0]  %s36_s17, 512, %s38_s19, [#allocation7], %s1022_s23, %s1022_s23, %s1023_s24  }
   0x9   :  { %s27_s25 = sshll.u32 %s1024_s9, 4  ;;  %s52_s28 = sshll.u32 %s1333_s4, 4  ;;  %s28_s25 = int_to_ptr.vmem [resolvable:$true] %s27_s25  ;;  %s53_s28 = int_to_ptr.hbm [resolvable:$true] %s52_s28 }
   0xa   :  { %30 = dma.hbm_to_vmem [thread:$0]  %s26_s22, 64, %s28_s25, [#allocation5]  }
   0xb   :  { %s70_s30 = sshll.u32 %s1336_s7, 4  ;;  %s1025_s11 = smov [#allocation8]   ;;  %s71_s30 = int_to_ptr.hbm [resolvable:$true] %s70_s30 }
   0xc   :  { %s54_s12 = sshll.u32 %s1025_s11, 4  ;;  %s1026_s0 = smov [#allocation9]   ;;  %s55_s12 = int_to_ptr.vmem [resolvable:$true] %s54_s12 }
   0xd   :  { %60 = dma.hbm_to_vmem [thread:$0]  %s53_s28, 512, %s55_s12, [#allocation7], %s1022_s23, %s1022_s23, %s1023_s24  }
   0xe   :  { %s72_s13 = sshll.u32 %s1026_s0, 4  ;;  %s73_s13 = int_to_ptr.vmem [resolvable:$true] %s72_s13 }
   0xf   :  { %75 = dma.hbm_to_vmem [thread:$0]  %s71_s30, 16, %s73_s13, [#allocation10]  }
  0x10   :  { %1015 = dma.done.wait [#allocation5], 64  }
  0x11   :  { %1016 = vsyncadd [#allocation5], 4294967232 }
  0x12   :  { %1017 = dma.done.wait [#allocation7], 1024  }
  0x13   :  { %1018 = vsyncadd [#allocation7], 4294966272 }
  0x14   :  { %1019 = dma.done.wait [#allocation10], 16  }
  0x15   :  { %1020 = vsyncadd [#allocation10], 4294967280  ;;  %v1027_v1 = vmov 0   ;;  %v1112_v2 = vld [vmem:[#allocation6 + $0x18] sm:$0xff]  ;;  %v1114_v3 = vld [vmem:[#allocation6 + $0x10] sm:$0xff]  ;;  %v1028_v7 = vmov 0.0   ;;  %v103_v12 = vlaneseq }
  0x16   :  { %861 = vset.pattern.permute.xlu0 %v1027_v1  ;;  %870 = vset.pattern.permute.xlu2 %v1027_v1  ;;  %v1117_v4 = vld [vmem:[#allocation4] sm:$0xf]  ;;  %v1120_v5 = vld [vmem:[#allocation6 + $0x8] sm:$0xff]  ;;  %v1126_v6 = vld [vmem:[#allocation6] sm:$0xff]  ;;  %v1029_v17 = vmov 1.0   ;;  %v1032_v34 = vmov 1  }
  0x17   :  { %181 = vmatpush.msra.mxu0 %v1112_v2  ;;  %235 = vmatpush.msra.mxu3 %v1112_v2  ;;  %v1158_v8 = vld [vmem:[%s1331_s2] ss:$0 sm:$0xff]  ;;  %v1167_v14 = vand.u32 127, %v103_v12  ;;  %s1030_s2 = smov 32   ;;  %vm165_vm2 = vcmask 261120   ;;  %v1033_v54 = vmov 2  }
  0x18   :  { %112 = vperm.xlu0 %861, %v1117_v4   ;;  %283 = vmatpush.msra.mxu2 %v1112_v2  ;;  %v1164_v11 = vld [vmem:[%s1332_s3] ss:$0 sm:$0xff]  ;;  %s1031_s3 = smov 64   ;;  %vm267_vm3 = vcmask 257024   ;;  %v1034_v12 = vmov 3  }
  0x19   :  { %182 = vmatpush.msra.mxu0 %v1114_v3  ;;  %236 = vmatpush.msra.mxu3 %v1114_v3  ;;  %vm105_vm0 = vcmp.lt.s32.totalorder %v1167_v14, 96  ;;  %vm108_vm1 = vcmp.lt.s32.totalorder %v1167_v14, 16  ;;  %vm760_vm8 = vcmp.eq.s32.totalorder %v1167_v14, 0  ;;  %vm767_vm9 = vcmp.eq.s32.totalorder %v1167_v14, 1 }
  0x1a   :  { %284 = vmatpush.msra.mxu2 %v1114_v3  ;;  %424 = vmatpush.msra.mxu1 %v1112_v2  ;;  %v1170_v18 = vsel %vm105_vm0, 0.5, %v1029_v17  ;;  %v1172_v20 = vsel %vm105_vm0, 0.5, %v1028_v7  ;;  %v109_v25 = vsel %vm108_vm1, 1.0, %v1028_v7  ;;  %vm772_vm10 = vcmp.eq.s32.totalorder %v1167_v14, 2 }
  0x1b   :  { %183 = vmatpush.msra.mxu0 %v1120_v5  ;;  %237 = vmatpush.msra.mxu3 %v1120_v5  ;;  %vm782_vm11 = vcmp.eq.s32.totalorder %v1167_v14, 3  ;;  %vm787_vm12 = vcmp.eq.s32.totalorder %v1167_v14, 4  ;;  %vm797_vm13 = vcmp.eq.s32.totalorder %v1167_v14, 5  ;;  %vm802_vm14 = vcmp.eq.s32.totalorder %v1167_v14, 6 }
  0x1c   :  { %285 = vmatpush.msra.mxu2 %v1120_v5  ;;  %425 = vmatpush.msra.mxu1 %v1114_v3  ;;  %vm812_vm15 = vcmp.eq.s32.totalorder %v1167_v14, 7  ;;  %vm817_vm0 = vcmask 64516  }
  0x1d   :  { %184 = vmatpush.msra.mxu0 %v1126_v6  ;;  %238 = vmatpush.msra.mxu3 %v1126_v6 }
  0x1e   :  { %185 = vmatmul.f32.vlgmr.msra.gmra.mxu0 %v1028_v7  ;;  %286 = vmatpush.msra.mxu2 %v1126_v6 }
  0x1f   :  { %330 = vmatpush.msrb.mxu3 %v1112_v2  ;;  %377 = vmatpush.msrb.mxu0 %v1112_v2 }
  0x20   :  { %426 = vmatpush.msra.mxu1 %v1120_v5  ;;  %471 = vmatpush.msrb.mxu2 %v1112_v2 }
  0x21   :  { %331 = vmatpush.msrb.mxu3 %v1114_v3  ;;  %378 = vmatpush.msrb.mxu0 %v1114_v3 }
  0x22   :  { %427 = vmatpush.msra.mxu1 %v1126_v6  ;;  %472 = vmatpush.msrb.mxu2 %v1114_v3 }
  0x23   :  { %332 = vmatpush.msrb.mxu3 %v1120_v5  ;;  %379 = vmatpush.msrb.mxu0 %v1120_v5 }
  0x24   :  { %473 = vmatpush.msrb.mxu2 %v1120_v5  ;;  %210 = vrot.lane.b32.xlu2 %v109_v25, %s1031_s3 }
  0x25   :  { %333 = vmatpush.msrb.mxu3 %v1126_v6  ;;  %380 = vmatpush.msrb.mxu0 %v1126_v6 }
  0x26   :  { %474 = vmatpush.msrb.mxu2 %v1126_v6  ;;  %862 = vset.pattern.permute.xlu0 %v1032_v34 }
  0x27   :  { %565 = vmatpush.msra.mxu0 %v1112_v2  ;;  %863 = vset.pattern.permute.xlu1 %v1033_v54  ;;  %v603_v54 = vld [vmem:[#allocation8 + $0x8] sm:$0xff] }
  0x29   :  { %566 = vmatpush.msra.mxu0 %v1114_v3 }
  0x2b   :  { %567 = vmatpush.msra.mxu0 %v1120_v5 }
  0x2d   :  { %568 = vmatpush.msra.mxu0 %v1126_v6 }
  0x7e   :  { %v211_v31 = vpop.permute.xlu2 %210 }
  0x8a   :  { %v113_v9 = vpop.permute.xlu0 %112 }
  0x8b   :  { %v118_v10 = vmul.f32 %v1158_v8, %v113_v9 }
  0x8d   :  { %v122_v13 = vadd.f32 %v1164_v11, %v118_v10 }
  0x9b   :  { %v186_v15 = vpop.f32.mrf.mxu0 }
  0x9c   :  { %v187_v16 = vadd.f32 %v186_v15, %v122_v13 }
  0x9e   :  { %879 = vtanh.f32 %v187_v16 }
  0xa4   :  { %v880_v19 = vpop.eup %879 }
  0xa5   :  { %v190_v21 = vmul.f32 %v880_v19, %v1170_v18 }
  0xa7   :  { %v191_v22 = vadd.f32 %v190_v21, %v1172_v20 }
  0xa9   :  { %194 = vrot.lane.b32.xlu0 %v191_v22, %s1030_s2  ;;  %v192_v26 = vmul.f32 0.0, %v191_v22 }
  0xb1   :  { %124 = vperm.xlu0 %862, %v1117_v4  }
  0xb9   :  { %864 = vset.pattern.permute.xlu0 %v1034_v12 }
 0x11b   :  { %v195_v23 = vpop.permute.xlu0 %194 }
 0x11c   :  { %v197_v24 = vmul.f32 %v195_v23, %v191_v22 }
 0x11e   :  { %199 = vrot.lane.b32.xlu1 %v197_v24, %s1030_s2 }
 0x123   :  { %v125_v36 = vpop.permute.xlu0 %124 }
 0x124   :  { %v127_v37 = vmul.f32 %v1158_v8, %v125_v36 }
 0x126   :  { %v128_v38 = vadd.f32 %v1164_v11, %v127_v37 }
 0x190   :  { %v200_v27 = vpop.permute.xlu1 %199 }
 0x191   :  { %v202_v28 = vadd.f32 %v200_v27, %v192_v26 }
 0x193   :  { %881 = vtanh.f32 %v202_v28 }
 0x199   :  { %v882_v29 = vpop.eup %881 }
 0x19a   :  { %205 = vrot.lane.b32.xlu1 %v882_v29, %s1030_s2 }
 0x20c   :  { %v206_v30 = vpop.permute.xlu1 %205 }
 0x20d   :  { %v208_v32 = vmul.f32 %v206_v30, %v191_v22 }
 0x20f   :  { %v213_v33 = vmul.f32 %v211_v31, %v208_v32 }
 0x211   :  { %219 = vrot.lane.b32.xlu2 %v213_v33, %s1031_s3  ;;  %v1035_v33 = vmov 4  }
 0x219   :  { %214 = vrot.lane.b32.xlu2 %v109_v25, %s1030_s2 }
 0x26b   :  { %v220_v35 = vpop.permute.xlu2 %219 }
 0x26c   :  { %826 = vmatmul.msk.f32.vlgmr.msra.gmra.mxu3 %vm165_vm2, %v220_v35 }
 0x26d   :  { %518 = vmatpush.msra.mxu3 %v1112_v2 }
 0x26f   :  { %519 = vmatpush.msra.mxu3 %v1114_v3 }
 0x271   :  { %520 = vmatpush.msra.mxu3 %v1120_v5 }
 0x273   :  { %521 = vmatpush.msra.mxu3 %v1126_v6  ;;  %v215_v46 = vpop.permute.xlu2 %214 }
 0x274   :  { %v217_v47 = vmul.f32 %v215_v46, %v202_v28 }
 0x2ef   :  { %v240_v39 = vpop.f32.mrf.mxu3 }
 0x2f0   :  { %v241_v40 = vadd.f32 %v240_v39, %v128_v38 }
 0x2f2   :  { %883 = vtanh.f32 %v241_v40 }
 0x2f8   :  { %v884_v41 = vpop.eup %883 }
 0x2f9   :  { %v244_v42 = vmul.f32 %v884_v41, %v1170_v18 }
 0x2fb   :  { %v245_v43 = vadd.f32 %v244_v42, %v1172_v20 }
 0x2fd   :  { %248 = vrot.lane.b32.xlu1 %v245_v43, %s1030_s2  ;;  %v246_v48 = vmul.f32 %v245_v43, %v217_v47 }
 0x36f   :  { %v249_v44 = vpop.permute.xlu1 %248 }
 0x370   :  { %v251_v45 = vmul.f32 %v249_v44, %v245_v43 }
 0x372   :  { %253 = vrot.lane.b32.xlu1 %v251_v45, %s1030_s2 }
 0x37a   :  { %130 = vperm.xlu1 %863, %v1117_v4  }
 0x382   :  { %869 = vset.pattern.permute.xlu1 %v1027_v1 }
 0x3e4   :  { %v254_v49 = vpop.permute.xlu1 %253 }
 0x3e5   :  { %v256_v50 = vadd.f32 %v254_v49, %v246_v48 }
 0x3e7   :  { %885 = vtanh.f32 %v256_v50 }
 0x3ec   :  { %v131_v56 = vpop.permute.xlu1 %130 }
 0x3ed   :  { %v886_v51 = vpop.eup %885  ;;  %v133_v57 = vmul.f32 %v1158_v8, %v131_v56 }
 0x3ee   :  { %259 = vrot.lane.b32.xlu2 %v886_v51, %s1030_s2  ;;  %v605_v51 = vld [vmem:[#allocation8 + $0x18] sm:$0xff] }
 0x3ef   :  { %v134_v58 = vadd.f32 %v1164_v11, %v133_v57  ;;  %634 = vmatpush.msrb.mxu1 %v605_v51 }
 0x448   :  { %v260_v52 = vpop.permute.xlu2 %259 }
 0x449   :  { %v262_v53 = vmul.f32 %v260_v52, %v245_v43  ;;  %v604_v52 = vld [vmem:[#allocation8 + $0x10] sm:$0xff] }
 0x44a   :  { %635 = vmatpush.msrb.mxu1 %v604_v52 }
 0x44b   :  { %264 = vrot.lane.b32.xlu0 %v262_v53, %s1031_s3  ;;  %v1036_v53 = vmov 5  }
 0x44c   :  { %636 = vmatpush.msrb.mxu1 %v603_v54 }
 0x4bd   :  { %v265_v55 = vpop.permute.xlu0 %264 }
 0x4be   :  { %268 = vst.msk [vmem:[#allocation2] sm:$0xf] %vm267_vm3, %v265_v55  ;;  %827 = vmatmul.msk.f32.vlgmr.msra.gmra.mxu2 %vm165_vm2, %v265_v55  ;;  %v602_v55 = vld [vmem:[#allocation8] sm:$0xff] }
 0x4bf   :  { %838 = vmatpush.msra.mxu2 %v605_v51  ;;  %637 = vmatpush.msrb.mxu1 %v602_v55 }
 0x4c1   :  { %839 = vmatpush.msra.mxu2 %v604_v52 }
 0x4c3   :  { %840 = vmatpush.msra.mxu2 %v603_v54 }
 0x4c5   :  { %841 = vmatpush.msra.mxu2 %v602_v55 }
 0x541   :  { %v288_v59 = vpop.f32.mrf.mxu2 }
 0x542   :  { %v289_v60 = vadd.f32 %v288_v59, %v134_v58 }
 0x544   :  { %887 = vtanh.f32 %v289_v60 }
 0x54a   :  { %v888_v61 = vpop.eup %887 }
 0x54b   :  { %v292_v62 = vmul.f32 %v888_v61, %v1170_v18 }
 0x54d   :  { %v293_v63 = vadd.f32 %v292_v62, %v1172_v20 }
 0x54f   :  { %296 = vrot.lane.b32.xlu2 %v293_v63, %s1030_s2  ;;  %v294_v3 = vmul.f32 %v293_v63, %v256_v50 }
 0x5a9   :  { %v297_v0 = vpop.permute.xlu2 %296 }
 0x5aa   :  { %v299_v2 = vmul.f32 %v297_v0, %v293_v63 }
 0x5ac   :  { %301 = vrot.lane.b32.xlu0 %v299_v2, %s1030_s2 }
 0x5b4   :  { %136 = vperm.xlu0 %864, %v1117_v4  }
 0x5bc   :  { %865 = vset.pattern.permute.xlu0 %v1035_v33 }
 0x5bd   :  { %142 = vperm.xlu0 %865, %v1117_v4  }
 0x5c5   :  { %866 = vset.pattern.permute.xlu0 %v1036_v53 }
 0x5c6   :  { %148 = vperm.xlu0 %866, %v1117_v4  }
 0x61e   :  { %v302_v5 = vpop.permute.xlu0 %301 }
 0x61f   :  { %v304_v6 = vadd.f32 %v302_v5, %v294_v3 }
 0x621   :  { %889 = vtanh.f32 %v304_v6 }
 0x626   :  { %v137_v15 = vpop.permute.xlu0 %136 }
 0x627   :  { %v890_v7 = vpop.eup %889  ;;  %v139_v16 = vmul.f32 %v1158_v8, %v137_v15 }
 0x628   :  { %307 = vrot.lane.b32.xlu1 %v890_v7, %s1030_s2 }
 0x629   :  { %v140_v17 = vadd.f32 %v1164_v11, %v139_v16  ;;  %v1037_v16 = vmov 6  }
 0x62a   :  { %867 = vset.pattern.permute.xlu0 %v1037_v16 }
 0x62b   :  { %154 = vperm.xlu0 %867, %v1117_v4  }
 0x62f   :  { %v143_v35 = vpop.permute.xlu0 %142 }
 0x630   :  { %v145_v36 = vmul.f32 %v1158_v8, %v143_v35 }
 0x632   :  { %v146_v37 = vadd.f32 %v1164_v11, %v145_v36  ;;  %v1038_v36 = vmov 7  }
 0x633   :  { %868 = vset.pattern.permute.xlu0 %v1038_v36 }
 0x634   :  { %160 = vperm.xlu0 %868, %v1117_v4  }
 0x638   :  { %v149_v59 = vpop.permute.xlu0 %148 }
 0x639   :  { %v151_v60 = vmul.f32 %v1158_v8, %v149_v59 }
 0x63b   :  { %v152_v61 = vadd.f32 %v1164_v11, %v151_v60 }
 0x63c   :  { %871 = vset.pattern.permute.xlu0 %v1027_v1 }
 0x69a   :  { %v308_v9 = vpop.permute.xlu1 %307 }
 0x69b   :  { %v310_v10 = vmul.f32 %v308_v9, %v293_v63 }
 0x69d   :  { %312 = vrot.lane.b32.xlu2 %v310_v10, %s1031_s3 }
 0x6f7   :  { %v313_v13 = vpop.permute.xlu2 %312 }
 0x6f8   :  { %315 = vst.msk [vmem:[#allocation2 + $0x4] sm:$0xf] %vm267_vm3, %v313_v13  ;;  %828 = vmatmul.msk.f32.vlgmr.msrb.gmra.mxu3 %vm165_vm2, %v313_v13 }
 0x6ff   :  { %v598_v57 = vld [vmem:[#allocation2] sm:$0xff] }
 0x77b   :  { %v335_v19 = vpop.f32.mrf.mxu3 }
 0x77c   :  { %v336_v21 = vadd.f32 %v335_v19, %v140_v17  ;;  %v155_v19 = vpop.permute.xlu0 %154 }
 0x77e   :  { %891 = vtanh.f32 %v336_v21  ;;  %v157_v21 = vmul.f32 %v1158_v8, %v155_v19 }
 0x784   :  { %v892_v22 = vpop.eup %891 }
 0x785   :  { %v339_v23 = vmul.f32 %v892_v22, %v1170_v18  ;;  %v158_v22 = vadd.f32 %v1164_v11, %v157_v21 }
 0x787   :  { %v340_v24 = vadd.f32 %v339_v23, %v1172_v20 }
 0x789   :  { %343 = vrot.lane.b32.xlu1 %v340_v24, %s1030_s2  ;;  %v341_v27 = vmul.f32 %v340_v24, %v304_v6 }
 0x7fb   :  { %v344_v25 = vpop.permute.xlu1 %343 }
 0x7fc   :  { %v346_v26 = vmul.f32 %v344_v25, %v340_v24 }
 0x7fe   :  { %348 = vrot.lane.b32.xlu2 %v346_v26, %s1030_s2 }
 0x858   :  { %v349_v28 = vpop.permute.xlu2 %348 }
 0x859   :  { %v351_v29 = vadd.f32 %v349_v28, %v341_v27 }
 0x85b   :  { %893 = vtanh.f32 %v351_v29 }
 0x861   :  { %v894_v30 = vpop.eup %893 }
 0x862   :  { %354 = vrot.lane.b32.xlu1 %v894_v30, %s1030_s2 }
 0x8d4   :  { %v355_v31 = vpop.permute.xlu1 %354 }
 0x8d5   :  { %v357_v32 = vmul.f32 %v355_v31, %v340_v24 }
 0x8d7   :  { %359 = vrot.lane.b32.xlu2 %v357_v32, %s1031_s3 }
 0x931   :  { %v360_v34 = vpop.permute.xlu2 %359 }
 0x932   :  { %362 = vst.msk [vmem:[#allocation2 + $0x8] sm:$0xf] %vm267_vm3, %v360_v34  ;;  %829 = vmatmul.msk.f32.vlgmr.msrb.gmra.mxu0 %vm165_vm2, %v360_v34 }
 0x9af   :  { %v382_v38 = vpop.f32.mrf.mxu0 }
 0x9b0   :  { %v383_v39 = vadd.f32 %v382_v38, %v146_v37 }
 0x9b2   :  { %895 = vtanh.f32 %v383_v39  ;;  %v161_v39 = vpop.permute.xlu0 %160 }
 0x9b8   :  { %v896_v40 = vpop.eup %895 }
 0x9b9   :  { %v386_v41 = vmul.f32 %v896_v40, %v1170_v18  ;;  %v163_v40 = vmul.f32 %v1158_v8, %v161_v39 }
 0x9bb   :  { %v387_v42 = vadd.f32 %v386_v41, %v1172_v20  ;;  %v164_v41 = vadd.f32 %v1164_v11, %v163_v40 }
 0x9bd   :  { %390 = vrot.lane.b32.xlu1 %v387_v42, %s1030_s2  ;;  %v388_v45 = vmul.f32 %v387_v42, %v351_v29 }
 0xa2f   :  { %v391_v43 = vpop.permute.xlu1 %390 }
 0xa30   :  { %v393_v44 = vmul.f32 %v391_v43, %v387_v42 }
 0xa32   :  { %395 = vrot.lane.b32.xlu2 %v393_v44, %s1030_s2 }
 0xa8c   :  { %v396_v46 = vpop.permute.xlu2 %395 }
 0xa8d   :  { %v398_v47 = vadd.f32 %v396_v46, %v388_v45 }
 0xa8f   :  { %897 = vtanh.f32 %v398_v47 }
 0xa95   :  { %v898_v48 = vpop.eup %897 }
 0xa96   :  { %401 = vrot.lane.b32.xlu1 %v898_v48, %s1030_s2 }
 0xb08   :  { %v402_v49 = vpop.permute.xlu1 %401 }
 0xb09   :  { %v404_v50 = vmul.f32 %v402_v49, %v387_v42 }
 0xb0b   :  { %406 = vrot.lane.b32.xlu2 %v404_v50, %s1031_s3 }
 0xb65   :  { %v407_v56 = vpop.permute.xlu2 %406 }
 0xb66   :  { %409 = vst.msk [vmem:[#allocation2 + $0xc] sm:$0xf] %vm267_vm3, %v407_v56  ;;  %830 = vmatmul.msk.f32.vlgmr.msra.gmra.mxu1 %vm165_vm2, %v407_v56 }
 0xb6d   :  { %v599_v58 = vld [vmem:[#allocation2 + $0x8] sm:$0xff] }
 0xb6e   :  { %834 = vmatmul.msk.f32.vlgmr.msrb.gmra.mxu1 %vm165_vm2, %v598_v57 }
 0xb76   :  { %835 = vmatmul.msk.f32.gmra.mxu1 %vm165_vm2, %v599_v58 }
 0xbe3   :  { %v429_v62 = vpop.f32.mrf.mxu1 }
 0xbe4   :  { %v430_v63 = vadd.f32 %v429_v62, %v152_v61 }
 0xbe6   :  { %899 = vtanh.f32 %v430_v63 }
 0xbec   :  { %v900_v0 = vpop.eup %899 }
 0xbed   :  { %v433_v2 = vmul.f32 %v900_v0, %v1170_v18 }
 0xbef   :  { %v434_v3 = vadd.f32 %v433_v2, %v1172_v20  ;;  %v639_v2 = vpop.f32.mrf.mxu1 }
 0xbf1   :  { %437 = vrot.lane.b32.xlu1 %v434_v3, %s1030_s2  ;;  %v435_v7 = vmul.f32 %v434_v3, %v398_v47 }
 0xc63   :  { %v438_v5 = vpop.permute.xlu1 %437 }
 0xc64   :  { %v440_v6 = vmul.f32 %v438_v5, %v434_v3  ;;  %v874_v5 = vld [vmem:[%s1334_s5] ss:$0 sm:$0xff] }
 0xc66   :  { %442 = vrot.lane.b32.xlu2 %v440_v6, %s1030_s2 }
 0xcc0   :  { %v443_v9 = vpop.permute.xlu2 %442 }
 0xcc1   :  { %v445_v10 = vadd.f32 %v443_v9, %v435_v7  ;;  %v1039_v7 = vmov 32.0  }
 0xcc3   :  { %901 = vtanh.f32 %v445_v10 }
 0xcc9   :  { %v902_v12 = vpop.eup %901 }
 0xcca   :  { %448 = vrot.lane.b32.xlu1 %v902_v12, %s1030_s2 }
 0xd3c   :  { %v449_v13 = vpop.permute.xlu1 %448 }
 0xd3d   :  { %v451_v15 = vmul.f32 %v449_v13, %v434_v3  ;;  %v642_v3 = vpop.f32.mrf.mxu1 }
 0xd3e   :  { %v1282_v9 = vadd.f32 %v874_v5, %v642_v3 }
 0xd3f   :  { %453 = vrot.lane.b32.xlu2 %v451_v15, %s1031_s3 }
 0xd40   :  { %v673_v13 = vmul.f32 %v1282_v9, %v1282_v9 }
 0xd99   :  { %v454_v17 = vpop.permute.xlu2 %453 }
 0xd9a   :  { %456 = vst.msk [vmem:[#allocation2 + $0x10] sm:$0xf] %vm267_vm3, %v454_v17  ;;  %831 = vmatmul.msk.f32.vlgmr.msrb.gmra.mxu2 %vm165_vm2, %v454_v17  ;;  %v652_v17 = vsel %vm165_vm2, %v1282_v9, 0.0 }
 0xe1d   :  { %v476_v23 = vpop.f32.mrf.mxu2 }
 0xe1e   :  { %v477_v24 = vadd.f32 %v476_v23, %v158_v22  ;;  %v677_v22 = vsel %vm165_vm2, %v673_v13, 0.0 }
 0xe20   :  { %903 = vtanh.f32 %v477_v24 }
 0xe26   :  { %v904_v25 = vpop.eup %903 }
 0xe27   :  { %v480_v26 = vmul.f32 %v904_v25, %v1170_v18 }
 0xe29   :  { %v481_v27 = vadd.f32 %v480_v26, %v1172_v20 }
 0xe2b   :  { %484 = vrot.lane.b32.xlu1 %v481_v27, %s1030_s2  ;;  %v482_v30 = vmul.f32 %v481_v27, %v445_v10  ;;  %v1284_v10 = vadd.f32 %v874_v5, %v639_v2 }
 0xe2d   :  { %v672_v16 = vmul.f32 %v1284_v10, %v1284_v10  ;;  %v651_v21 = vsel %vm165_vm2, %v1284_v10, 0.0 }
 0xe2e   :  { %v653_v25 = vadd.f32 %v652_v17, %v651_v21 }
 0xe9d   :  { %v485_v28 = vpop.permute.xlu1 %484 }
 0xe9e   :  { %v487_v29 = vmul.f32 %v485_v28, %v481_v27 }
 0xea0   :  { %489 = vrot.lane.b32.xlu2 %v487_v29, %s1030_s2 }
 0xefa   :  { %v490_v31 = vpop.permute.xlu2 %489 }
 0xefb   :  { %v492_v32 = vadd.f32 %v490_v31, %v482_v30 }
 0xefd   :  { %905 = vtanh.f32 %v492_v32 }
 0xf03   :  { %v906_v33 = vpop.eup %905 }
 0xf04   :  { %495 = vrot.lane.b32.xlu1 %v906_v33, %s1030_s2 }
 0xf76   :  { %v496_v34 = vpop.permute.xlu1 %495 }
 0xf77   :  { %v498_v35 = vmul.f32 %v496_v34, %v481_v27  ;;  %v676_v27 = vsel %vm165_vm2, %v672_v16, 0.0 }
 0xf78   :  { %v678_v30 = vadd.f32 %v677_v22, %v676_v27 }
 0xf79   :  { %500 = vrot.lane.b32.xlu2 %v498_v35, %s1031_s3 }
 0xfd3   :  { %v501_v37 = vpop.permute.xlu2 %500 }
 0xfd4   :  { %503 = vst.msk [vmem:[#allocation2 + $0x14] sm:$0xf] %vm267_vm3, %v501_v37  ;;  %832 = vmatmul.msk.f32.vlgmr.msra.gmra.mxu3 %vm165_vm2, %v501_v37 }
 0xfdb   :  { %v600_v38 = vld [vmem:[#allocation2 + $0x10] sm:$0xff] }
 0xfdc   :  { %836 = vmatmul.msk.f32.vlgmr.msra.gmra.mxu2 %vm165_vm2, %v600_v38 }
0x1057   :  { %v523_v42 = vpop.f32.mrf.mxu3 }
0x1058   :  { %v524_v43 = vadd.f32 %v523_v42, %v164_v41 }
0x105a   :  { %907 = vtanh.f32 %v524_v43 }
0x105f   :  { %v645_v6 = vpop.f32.mrf.mxu2 }
0x1060   :  { %v908_v44 = vpop.eup %907  ;;  %v1286_v12 = vadd.f32 %v874_v5, %v645_v6  ;;  %v876_v6 = vld [vmem:[#allocation9] ss:$0 sm:$0xff] }
0x1061   :  { %v527_v4 = vmul.f32 %v908_v44, %v1170_v18 }
0x1062   :  { %v674_v19 = vmul.f32 %v1286_v12, %v1286_v12  ;;  %v654_v23 = vsel %vm165_vm2, %v1286_v12, 0.0 }
0x1063   :  { %v528_v1 = vadd.f32 %v527_v4, %v1172_v20  ;;  %v655_v31 = vadd.f32 %v654_v23, %v653_v25 }
0x1064   :  { %v679_v28 = vsel %vm165_vm2, %v674_v19, 0.0 }
0x1065   :  { %531 = vrot.lane.b32.xlu1 %v528_v1, %s1030_s2  ;;  %v529_v47 = vmul.f32 %v528_v1, %v492_v32  ;;  %v680_v35 = vadd.f32 %v679_v28, %v678_v30 }
0x10d7   :  { %v532_v45 = vpop.permute.xlu1 %531 }
0x10d8   :  { %v534_v46 = vmul.f32 %v532_v45, %v528_v1 }
0x10da   :  { %536 = vrot.lane.b32.xlu2 %v534_v46, %s1030_s2 }
0x1134   :  { %v537_v48 = vpop.permute.xlu2 %536 }
0x1135   :  { %v539_v49 = vadd.f32 %v537_v48, %v529_v47 }
0x1137   :  { %909 = vtanh.f32 %v539_v49 }
0x113d   :  { %v910_v8 = vpop.eup %909 }
0x113e   :  { %542 = vrot.lane.b32.xlu1 %v910_v8, %s1030_s2 }
0x11b0   :  { %v543_v50 = vpop.permute.xlu1 %542 }
0x11b1   :  { %v545_v51 = vmul.f32 %v543_v50, %v528_v1 }
0x11b3   :  { %547 = vrot.lane.b32.xlu2 %v545_v51, %s1031_s3 }
0x120d   :  { %v548_v52 = vpop.permute.xlu2 %547 }
0x120e   :  { %550 = vst.msk [vmem:[#allocation2 + $0x18] sm:$0xf] %vm267_vm3, %v548_v52  ;;  %833 = vmatmul.msk.f32.vlgmr.msra.gmra.mxu0 %vm165_vm2, %v548_v52 }
0x128b   :  { %v570_v53 = vpop.f32.mrf.mxu0 }
0x128c   :  { %v571_v54 = vadd.f32 %v1164_v11, %v570_v53 }
0x128e   :  { %911 = vtanh.f32 %v571_v54 }
0x1294   :  { %v912_v55 = vpop.eup %911 }
0x1295   :  { %v574_v56 = vmul.f32 %v912_v55, %v1170_v18 }
0x1297   :  { %v575_v57 = vadd.f32 %v574_v56, %v1172_v20 }
0x1299   :  { %578 = vrot.lane.b32.xlu0 %v575_v57, %s1030_s2  ;;  %v576_v60 = vmul.f32 %v575_v57, %v539_v49 }
0x130b   :  { %v579_v58 = vpop.permute.xlu0 %578 }
0x130c   :  { %v581_v59 = vmul.f32 %v579_v58, %v575_v57 }
0x130e   :  { %583 = vrot.lane.b32.xlu1 %v581_v59, %s1030_s2 }
0x1380   :  { %v584_v61 = vpop.permute.xlu1 %583 }
0x1381   :  { %v586_v62 = vadd.f32 %v584_v61, %v576_v60 }
0x1383   :  { %913 = vtanh.f32 %v586_v62 }
0x1384   :  { %915 = vrcp.f32 %v1039_v7 }
0x1389   :  { %v914_v63 = vpop.eup %913 }
0x138a   :  { %589 = vrot.lane.b32.xlu2 %v914_v63, %s1030_s2  ;;  %v916_v15 = vpop.eup %915 }
0x138b   :  { %v665_v24 = vmul.f32 32.0, %v916_v15  ;;  %vm669_vm4 = vweird.f32 %v916_v15 }
0x138d   :  { %v666_v33 = vsub.f32 1.0, %v665_v24 }
0x138f   :  { %v667_v40 = vmul.f32 %v916_v15, %v666_v33 }
0x1391   :  { %v668_v4 = vadd.f32 %v916_v15, %v667_v40 }
0x1393   :  { %v670_v48 = vsel %vm669_vm4, %v916_v15, %v668_v4 }
0x13e4   :  { %v590_v11 = vpop.permute.xlu2 %589 }
0x13e5   :  { %v592_v0 = vmul.f32 %v590_v11, %v575_v57 }
0x13e7   :  { %594 = vrot.lane.b32.xlu0 %v592_v0, %s1031_s3  ;;  %v875_v0 = vld [vmem:[%s1335_s6] ss:$0 sm:$0xff] }
0x1459   :  { %v595_v18 = vpop.permute.xlu0 %594 }
0x145a   :  { %597 = vst.msk [vmem:[#allocation2 + $0x1c] sm:$0xf] %vm267_vm3, %v595_v18 }
0x1461   :  { %v601_v20 = vld [vmem:[#allocation2 + $0x18] sm:$0xff] }
0x1462   :  { %837 = vmatmul.msk.f32.gmra.mxu2 %vm165_vm2, %v601_v20 }
0x14e5   :  { %v648_v26 = vpop.f32.mrf.mxu2 }
0x14e6   :  { %v649_v29 = vadd.f32 %v874_v5, %v648_v26 }
0x14e8   :  { %v656_v32 = vsel %vm165_vm2, %v649_v29, 0.0  ;;  %v675_v34 = vmul.f32 %v649_v29, %v649_v29 }
0x14e9   :  { %v657_v36 = vadd.f32 %v656_v32, %v655_v31 }
0x14ea   :  { %v681_v37 = vsel %vm165_vm2, %v675_v34, 0.0 }
0x14eb   :  { %v658_v38 = vrot.slane %v657_v36, 4  ;;  %v682_v39 = vadd.f32 %v681_v37, %v680_v35  ;;  %v878_v35 = vld [vmem:[#allocation3] ss:$0 sm:$0xff] }
0x14ed   :  { %v659_v41 = vadd.f32 %v658_v38, %v657_v36  ;;  %v683_v42 = vrot.slane %v682_v39, 4 }
0x14ef   :  { %v660_v43 = vrot.slane %v659_v41, 2  ;;  %v684_v44 = vadd.f32 %v683_v42, %v682_v39 }
0x14f1   :  { %v661_v1 = vadd.f32 %v660_v43, %v659_v41  ;;  %v685_v45 = vrot.slane %v684_v44, 2 }
0x14f3   :  { %v662_v46 = vrot.slane %v661_v1, 1  ;;  %v686_v47 = vadd.f32 %v685_v45, %v684_v44 }
0x14f5   :  { %v663_v49 = vadd.f32 %v662_v46, %v661_v1  ;;  %v687_v8 = vrot.slane %v686_v47, 1 }
0x14f7   :  { %v671_v50 = vmul.f32 %v670_v48, %v663_v49  ;;  %v688_v51 = vadd.f32 %v687_v8, %v686_v47 }
0x14f9   :  { %v689_v52 = vmul.f32 %v688_v51, %v670_v48  ;;  %v690_v53 = vmul.f32 %v671_v50, %v671_v50  ;;  %v696_v63 = vsub.f32 %v649_v29, %v671_v50  ;;  %v695_v11 = vsub.f32 %v1286_v12, %v671_v50  ;;  %v877_v12 = vld [vmem:[%s1337_s8] ss:$0 sm:$0xff] }
0x14fa   :  { %v694_v18 = vsub.f32 %v1282_v9, %v671_v50  ;;  %v693_v20 = vsub.f32 %v1284_v10, %v671_v50 }
0x14fb   :  { %v691_v54 = vsub.f32 %v689_v52, %v690_v53 }
0x14fd   :  { %v692_v55 = vmax.f32 %v691_v54, 0.0 }
0x14ff   :  { %v697_v56 = vadd.f32 1e-05, %v692_v55 }
0x1501   :  { %917 = vrsqrt.f32 %v697_v56  ;;  %vm704_vm6 = vweird.f32 %v697_v56 }
0x1507   :  { %v918_v57 = vpop.eup %917 }
0x1508   :  { %v699_v58 = vmul.f32 %v918_v57, %v697_v56  ;;  %vm705_vm5 = vweird.f32 %v918_v57 }
0x1509   :  { %vm706_vm7 = vmor %vm704_vm6, %vm705_vm5 }
0x150a   :  { %v700_v59 = vmul.f32 %v918_v57, %v699_v58 }
0x150c   :  { %v701_v60 = vmul.f32 0.5, %v700_v59 }
0x150e   :  { %v702_v61 = vsub.f32 1.5, %v701_v60 }
0x1510   :  { %v703_v62 = vmul.f32 %v918_v57, %v702_v61 }
0x1512   :  { %v707_v2 = vsel %vm706_vm7, %v918_v57, %v703_v62 }
0x1513   :  { %v711_v3 = vmul.f32 %v707_v2, %v696_v63  ;;  %v710_v5 = vmul.f32 %v707_v2, %v695_v11  ;;  %v709_v7 = vmul.f32 %v707_v2, %v694_v18  ;;  %v708_v13 = vmul.f32 %v707_v2, %v693_v20 }
0x1515   :  { %v718_v15 = vmul.f32 %v875_v0, %v710_v5  ;;  %v717_v16 = vmul.f32 %v875_v0, %v709_v7  ;;  %v716_v17 = vmul.f32 %v875_v0, %v708_v13  ;;  %v719_v19 = vmul.f32 %v875_v0, %v711_v3 }
0x1517   :  { %v726_v21 = vadd.f32 %v876_v6, %v718_v15  ;;  %v725_v22 = vadd.f32 %v876_v6, %v717_v16  ;;  %v724_v23 = vadd.f32 %v876_v6, %v716_v17  ;;  %v727_v25 = vadd.f32 %v876_v6, %v719_v19 }
0x1519   :  { %v730_v9 = vmax.f32 %v726_v21, 0.0  ;;  %v729_v24 = vmax.f32 %v725_v22, 0.0  ;;  %v728_v10 = vmax.f32 %v724_v23, 0.0  ;;  %v731_v32 = vmax.f32 %v727_v25, 0.0 }
0x151b   :  { %v738_v26 = vmul.f32 %v877_v12, %v730_v9  ;;  %v737_v27 = vmul.f32 %v877_v12, %v729_v24  ;;  %v736_v28 = vmul.f32 %v877_v12, %v728_v10  ;;  %v739_v33 = vmul.f32 %v877_v12, %v731_v32 }
0x151d   :  { %v746_v29 = vsel %vm165_vm2, %v738_v26, 0.0  ;;  %v743_v30 = vsel %vm165_vm2, %v737_v27, 0.0  ;;  %v740_v31 = vsel %vm165_vm2, %v736_v28, 0.0  ;;  %v749_v34 = vsel %vm165_vm2, %v739_v33, 0.0 }
0x151e   :  { %747 = vadd.xlane.f32.xlu0 %v746_v29  ;;  %744 = vadd.xlane.f32.xlu2 %v743_v30 }
0x151f   :  { %741 = vadd.xlane.f32.xlu1 %v740_v31 }
0x1526   :  { %750 = vadd.xlane.f32.xlu2 %v749_v34 }
0x1591   :  { %v748_v36 = vpop.xlane.xlu0 %747  ;;  %v745_v37 = vpop.xlane.xlu2 %744 }
0x1592   :  { %v758_v38 = vadd.f32 %v878_v35, %v748_v36  ;;  %v757_v39 = vadd.f32 %v878_v35, %v745_v37  ;;  %v742_v40 = vpop.xlane.xlu1 %741 }
0x1593   :  { %v756_v41 = vadd.f32 %v878_v35, %v742_v40 }
0x1594   :  { %790 = vperm.xlu0 %871, %v758_v38   ;;  %775 = vperm.xlu2 %870, %v757_v39  }
0x1595   :  { %763 = vperm.xlu1 %869, %v756_v41  }
0x1599   :  { %v751_v42 = vpop.xlane.xlu2 %750 }
0x159a   :  { %v759_v43 = vadd.f32 %v878_v35, %v751_v42 }
0x159d   :  { %805 = vperm.xlu1 %869, %v759_v43  }
0x15ee   :  { %v776_v47 = vpop.permute.xlu2 %775 }
0x1606   :  { %v791_v51 = vpop.permute.xlu0 %790 }
0x1607   :  { %v764_v44 = vpop.permute.xlu1 %763 }
0x1608   :  { %v766_v4 = vsel %vm760_vm8, %v764_v44, 0.0 }
0x1609   :  { %v769_v1 = vrot.slane %v766_v4, 4 }
0x160b   :  { %v771_v45 = vsel %vm767_vm9, %v764_v44, %v769_v1 }
0x160c   :  { %v779_v46 = vrot.slane %v771_v45, 4 }
0x160e   :  { %v781_v48 = vsel %vm772_vm10, %v776_v47, %v779_v46 }
0x160f   :  { %v784_v49 = vrot.slane %v781_v48, 4  ;;  %v806_v56 = vpop.permute.xlu1 %805 }
0x1611   :  { %v786_v8 = vsel %vm782_vm11, %v776_v47, %v784_v49 }
0x1612   :  { %v794_v50 = vrot.slane %v786_v8, 4 }
0x1614   :  { %v796_v52 = vsel %vm787_vm12, %v791_v51, %v794_v50 }
0x1615   :  { %v799_v53 = vrot.slane %v796_v52, 4 }
0x1617   :  { %v801_v54 = vsel %vm797_vm13, %v791_v51, %v799_v53 }
0x1618   :  { %v809_v55 = vrot.slane %v801_v54, 4 }
0x161a   :  { %v811_v57 = vsel %vm802_vm14, %v806_v56, %v809_v55 }
0x161b   :  { %v814_v58 = vrot.slane %v811_v57, 4 }
0x161d   :  { %v816_v59 = vsel %vm812_vm15, %v806_v56, %v814_v58 }
0x161e   :  { %818 = vst.msk [vmem:[%s1339_s10 - $0x4] sm:$0xf0] %vm817_vm0, %v816_v59 }
0x161f   :  { %823 = vsyncpa [#allocation5], 1 }
0x1620   :  { %824 = vsyncpa [#allocation7], 1 }
0x1621   :  { %825 = vsyncpa [#allocation10], 1 }

</bundles_post_ra>
